<compile_context>
chip_gen: v5e
topology: v5e:2x2
jax: 0.10.0
libtpu: 0.0.40
codegen_flags: <defaults>
</compile_context>

<pallas_src>
import functools

import jax
import jax.numpy as jnp
import numpy as np
from jax.experimental import pallas as pl
from jax.experimental.pallas import tpu as pltpu


def _fourier_kernel(x_ref, o_ref, *, inv_scales, d):
    # x_ref: (TN, D) tile in VMEM; o_ref: (TN, 2*L*D) tile in VMEM.
    x = x_ref[...].astype(jnp.float32)
    l = len(inv_scales)
    # Static Python loop, static slices: each sin/cos chunk is written straight into its
    # slot of the output tile -- no concatenation, no output-sized intermediates.
    for k, inv_s in enumerate(inv_scales):
        xk = x * inv_s                                     # VPU vmul (no divide path)
        o_ref[:, k * d:(k + 1) * d] = jnp.sin(xk).astype(o_ref.dtype)
        o_ref[:, (l + k) * d:(l + k + 1) * d] = jnp.cos(xk).astype(o_ref.dtype)


def fourier_encoder(
    x,
    level,
    include_self=True,
    *,
    row_tile=None,
    out_block_bytes=4 * 1024 * 1024,       # target per-buffer output block size
    vmem_limit_bytes=32 * 1024 * 1024,     # safe on v5e/v6e/v7x; above worst-case usage here
):
    """Pallas TPU implementation of FourierEncoder.forward for 2-D x (N, D)."""
    del include_self  # unused in the reference forward
    n, d = x.shape

    # scales = 2 ** arange(-level/2, level/2)  (exactly `level` values).  Powers of two,
    # so multiplying by the reciprocal is bit-exact w.r.t. the reference division.
    scales = 2.0 ** np.arange(-level / 2.0, level / 2.0, dtype=np.float64)
    inv_scales = tuple(float(1.0 / s) for s in scales)
    l = len(inv_scales)
    out_cols = 2 * l * d
    itemsize = jnp.dtype(x.dtype).itemsize

    # --- Pick the row tile from a VMEM budget (largest tile whose double-buffered output
    # block stays comfortably inside scoped VMEM on every TPU generation). ---
    if row_tile is None:
        row_tile = out_block_bytes // max(1, out_cols * itemsize)
        row_tile = min(row_tile, 4096)
    n_ceil8 = ((n + 7) // 8) * 8
    row_tile = min(row_tile, n_ceil8)            # don't tile past the (padded) problem size
    row_tile = max(8, (row_tile // 8) * 8)       # sublane granularity

    # --- Handle N not divisible by row_tile by zero-padding rows (elementwise op). ---
    n_pad = ((n + row_tile - 1) // row_tile) * row_tile
    x_in = x if n_pad == n else jnp.pad(x, ((0, n_pad - n), (0, 0)))

    grid = (n_pad // row_tile,)
    kernel = functools.partial(_fourier_kernel, inv_scales=inv_scales, d=d)

    out = pl.pallas_call(
        kernel,
        out_shape=jax.ShapeDtypeStruct((n_pad, out_cols), x.dtype),
        grid_spec=pltpu.PrefetchScalarGridSpec(
            num_scalar_prefetch=0,
            grid=grid,
            in_specs=[pl.BlockSpec((row_tile, d), lambda i: (i, 0))],
            out_specs=pl.BlockSpec((row_tile, out_cols), lambda i: (i, 0)),
        ),
        compiler_params=pltpu.CompilerParams(
            dimension_semantics=("parallel",),
            vmem_limit_bytes=vmem_limit_bytes,
        ),
    )(x_in)

    return out if n_pad == n else out[:n]


def fourier_encoder_ref(x, level):
    """Pure-JAX reference mirroring the PyTorch module."""
    scales = 2.0 ** jnp.arange(-level / 2.0, level / 2.0, dtype=x.dtype)
    multiscale = jnp.concatenate([x / s for s in scales], axis=1)
    return jnp.concatenate([jnp.sin(multiscale), jnp.cos(multiscale)], axis=1)


if __name__ == "__main__":
    key = jax.random.PRNGKey(0)

    # Case 1: small, tile-aligned shapes (16 samples, 16 features, level=4 -> (16, 128)).
    level = 4
    n, d = 16, 16
    x = jax.random.normal(key, (n, d), dtype=jnp.float32)
    out = jax.block_until_ready(fourier_encoder(x, level))
    ref = fourier_encoder_ref(x, level)
    assert out.shape == (n, 2 * level * d), out.shape
    np.testing.assert_allclose(np.asarray(out), np.asarray(ref), rtol=1e-5, atol=1e-5)

    # Case 2: ragged row count (exercises the padding path).
    n2 = 13
    x2 = jax.random.normal(jax.random.PRNGKey(1), (n2, d), dtype=jnp.float32)
    out2 = jax.block_until_ready(fourier_encoder(x2, level))
    ref2 = fourier_encoder_ref(x2, level)
    assert out2.shape == (n2, 2 * level * d), out2.shape
    np.testing.assert_allclose(np.asarray(out2), np.asarray(ref2), rtol=1e-5, atol=1e-5)

    print("KERNEL_OK")
</pallas_src>

<mosaic_0001>
module attributes {stable_mosaic.version = 11 : i64} {
  func.func @_fourier_kernel(%arg0: i32, %arg1: memref<16x16xf32, #tpu.memory_space<vmem>>, %arg2: memref<16x128xf32, #tpu.memory_space<vmem>>) attributes {dimension_semantics = [#tpu.dimension_semantics<parallel>], iteration_bounds = array<i64: 1>, scalar_prefetch = 0 : i64, scratch_operands = 0 : i64, tpu.core_type = #tpu.core_type<tc>, window_params = [{transform_indices = @transform_0, window_bounds = array<i64: 16, 16>}, {transform_indices = @transform_1, window_bounds = array<i64: 16, 128>}]} {
    %c0 = arith.constant 0 : index
    %c0_0 = arith.constant 0 : index
    %0 = vector.load %arg1[%c0, %c0_0] : memref<16x16xf32, #tpu.memory_space<vmem>>, vector<16x16xf32>
    %cst = arith.constant 4.000000e+00 : f32
    %1 = vector.broadcast %cst : f32 to vector<16x16xf32>
    %2 = arith.mulf %0, %1 : vector<16x16xf32>
    %3 = math.sin %2 : vector<16x16xf32>
    %c0_1 = arith.constant 0 : index
    %c0_2 = arith.constant 0 : index
    %4 = vector.load %arg2[%c0_1, %c0_2] : memref<16x128xf32, #tpu.memory_space<vmem>>, vector<16x16xf32>
    tpu.vector_store %arg2[%c0_1, %c0_2], %3 {strides = array<i32>} : memref<16x128xf32, #tpu.memory_space<vmem>>, vector<16x16xf32>,
    %5 = math.cos %2 : vector<16x16xf32>
    %c0_3 = arith.constant 0 : index
    %c64 = arith.constant 64 : index
    %6 = vector.load %arg2[%c0_3, %c64] : memref<16x128xf32, #tpu.memory_space<vmem>>, vector<16x16xf32>
    tpu.vector_store %arg2[%c0_3, %c64], %5 {strides = array<i32>} : memref<16x128xf32, #tpu.memory_space<vmem>>, vector<16x16xf32>,
    %cst_4 = arith.constant 2.000000e+00 : f32
    %7 = vector.broadcast %cst_4 : f32 to vector<16x16xf32>
    %8 = arith.mulf %0, %7 : vector<16x16xf32>
    %9 = math.sin %8 : vector<16x16xf32>
    %c0_5 = arith.constant 0 : index
    %c16 = arith.constant 16 : index
    %10 = vector.load %arg2[%c0_5, %c16] : memref<16x128xf32, #tpu.memory_space<vmem>>, vector<16x16xf32>
    tpu.vector_store %arg2[%c0_5, %c16], %9 {strides = array<i32>} : memref<16x128xf32, #tpu.memory_space<vmem>>, vector<16x16xf32>,
    %11 = math.cos %8 : vector<16x16xf32>
    %c0_6 = arith.constant 0 : index
    %c80 = arith.constant 80 : index
    %12 = vector.load %arg2[%c0_6, %c80] : memref<16x128xf32, #tpu.memory_space<vmem>>, vector<16x16xf32>
    tpu.vector_store %arg2[%c0_6, %c80], %11 {strides = array<i32>} : memref<16x128xf32, #tpu.memory_space<vmem>>, vector<16x16xf32>,
    %cst_7 = arith.constant 1.000000e+00 : f32
    %13 = vector.broadcast %cst_7 : f32 to vector<16x16xf32>
    %14 = arith.mulf %0, %13 : vector<16x16xf32>
    %15 = math.sin %14 : vector<16x16xf32>
    %c0_8 = arith.constant 0 : index
    %c32 = arith.constant 32 : index
    %16 = vector.load %arg2[%c0_8, %c32] : memref<16x128xf32, #tpu.memory_space<vmem>>, vector<16x16xf32>
    tpu.vector_store %arg2[%c0_8, %c32], %15 {strides = array<i32>} : memref<16x128xf32, #tpu.memory_space<vmem>>, vector<16x16xf32>,
    %17 = math.cos %14 : vector<16x16xf32>
    %c0_9 = arith.constant 0 : index
    %c96 = arith.constant 96 : index
    %18 = vector.load %arg2[%c0_9, %c96] : memref<16x128xf32, #tpu.memory_space<vmem>>, vector<16x16xf32>
    tpu.vector_store %arg2[%c0_9, %c96], %17 {strides = array<i32>} : memref<16x128xf32, #tpu.memory_space<vmem>>, vector<16x16xf32>,
    %cst_10 = arith.constant 5.000000e-01 : f32
    %19 = vector.broadcast %cst_10 : f32 to vector<16x16xf32>
    %20 = arith.mulf %0, %19 : vector<16x16xf32>
    %21 = math.sin %20 : vector<16x16xf32>
    %c0_11 = arith.constant 0 : index
    %c48 = arith.constant 48 : index
    %22 = vector.load %arg2[%c0_11, %c48] : memref<16x128xf32, #tpu.memory_space<vmem>>, vector<16x16xf32>
    tpu.vector_store %arg2[%c0_11, %c48], %21 {strides = array<i32>} : memref<16x128xf32, #tpu.memory_space<vmem>>, vector<16x16xf32>,
    %23 = math.cos %20 : vector<16x16xf32>
    %c0_12 = arith.constant 0 : index
    %c112 = arith.constant 112 : index
    %24 = vector.load %arg2[%c0_12, %c112] : memref<16x128xf32, #tpu.memory_space<vmem>>, vector<16x16xf32>
    tpu.vector_store %arg2[%c0_12, %c112], %23 {strides = array<i32>} : memref<16x128xf32, #tpu.memory_space<vmem>>, vector<16x16xf32>,
    return
  }
  func.func @transform_0(%arg0: i32) -> (i32, i32) {
    %c0_i32 = arith.constant 0 : i32
    %c0_i32_0 = arith.constant 0 : i32
    return %arg0, %c0_i32 : i32, i32
  }
  func.func @transform_1(%arg0: i32) -> (i32, i32) {
    %c0_i32 = arith.constant 0 : i32
    %c0_i32_0 = arith.constant 0 : i32
    return %arg0, %c0_i32 : i32, i32
  }
}

</mosaic_0001>

<bundles_post_ra>
// kernel: tpu_custom_call.1
= control target key start
LH: loop header
LB: loop body
LE: loop exit
PB: predicated region body
PF: predicated region fallthrough
CT: control target
= control target key end

     0   :  { %6 = vsyncpa [#allocation3], 0  ;;  %s3771_s0 = inlined_call_operand.hbm [shape: f32[16,16], index: 0, kind: input, shape index: {}]   ;;  %s3772_s1 = inlined_call_operand.hbm [shape: f32[16,128], index: 1, kind: output, shape index: {}]  }
   0x1   :  { %7 = vsyncpa [#allocation4], 0  ;;  %s12_s8 = sshll.u32 %s3771_s0, 4  ;;  %s2724_s9 = smov [#allocation2]   ;;  %s13_s8 = int_to_ptr.hbm [resolvable:$true] %s12_s8 }
   0x2   :  { %s14_s10 = sshll.u32 %s2724_s9, 4  ;;  %s2725_s11 = smov 128   ;;  %s15_s10 = int_to_ptr.vmem [resolvable:$true] %s14_s10 }
   0x3   :  { %s2726_s12 = smov 8  }
   0x4   :  { %20 = dma.hbm_to_vmem [thread:$0]  %s13_s8, 256, %s15_s10, [#allocation3], %s2725_s11, %s2725_s11, %s2726_s12  }
   0x5   :  { %2720 = dma.done.wait [#allocation3], 256  }
   0x6   :  { %2721 = vsyncadd [#allocation3], 4294967040  ;;  %v2758_v0 = vld [vmem:[#allocation2 + $0x8] sm:$0xff]  ;;  %v2760_v1 = vld [vmem:[#allocation2] sm:$0xff]  ;;  %v2727_v26 = vmov 683565275  }
   0x7   :  { %v1458_v2 = vand.u32 2147483647, %v2758_v0  ;;  %v1461_v3 = vand.u32 2139095040, %v2758_v0  ;;  %v1303_v4 = vand.u32 2147483647, %v2760_v1  ;;  %v1306_v5 = vand.u32 2139095040, %v2760_v1 }
   0x8   :  { %v2769_v9 = vmul.f32 2.0, %v2760_v1  ;;  %v2728_v28 = vmov 2475754826   ;;  %v2729_v30 = vmov 2131351028   ;;  %s2734_s0 = smov 32  }
   0x9   :  { %v1462_v6 = vshrl.u32 %v1461_v3, 23  ;;  %v1465_v7 = vand.u32 8388607, %v1458_v2  ;;  %v1307_v8 = vshrl.u32 %v1306_v5, 23  ;;  %v1310_v13 = vand.u32 8388607, %v1303_v4 }
   0xa   :  { %v666_v16 = vand.u32 2139095040, %v2769_v9  ;;  %v2730_v32 = vmov 2102212464   ;;  %v2731_v34 = vmov 920167782   ;;  %s2735_s13 = smov 96  }
   0xb   :  { %v2631_v10 = vadd.s32 4294967169, %v1462_v6  ;;  %v1466_v11 = vor.u32 8388608, %v1465_v7  ;;  %v2628_v12 = vadd.s32 4294967169, %v1307_v8  ;;  %v1311_v19 = vor.u32 8388608, %v1310_v13  ;;  %s2736_s14 = smov 16   ;;  %s2737_s15 = smov 64  }
   0xc   :  { %v2780_v24 = vshrl.u32 %v666_v16, 23  ;;  %v2732_v43 = vmov 1326507024   ;;  %s2738_s16 = smov 48   ;;  %s2739_s17 = smov 112  }
   0xd   :  { %v1468_v14 = vadd.s32 1, %v2631_v10  ;;  %v1313_v15 = vadd.s32 1, %v2628_v12  ;;  %v2774_v18 = vshll.u32 %v1466_v11, 8  ;;  %v2788_v37 = vshll.u32 %v1311_v19, 8  ;;  %s2740_s18 = smov 80   ;;  %s2741_s19 = smov [#allocation5]  }
   0xe   :  { %s2589_s20 = sshll.u32 %s2741_s19, 4  ;;  %s2591_s23 = sshll.u32 %s3772_s1, 4  ;;  %s2590_s20 = int_to_ptr.vmem [resolvable:$true] %s2589_s20  ;;  %s2592_s23 = int_to_ptr.hbm [resolvable:$true] %s2591_s23 }
   0xf   :  { %vm1469_vm0 = vcmp.gt.s32.totalorder %v1468_v14, 0  ;;  %vm1314_vm1 = vcmp.gt.s32.totalorder %v1313_v15, 0  ;;  %v1507_v36 = vand.u32 65535, %v2774_v18  ;;  %v1508_v41 = vshrl.u32 %v2774_v18, 16 }
  0x10   :  { %v1470_v17 = vsel %vm1469_vm0, %v1468_v14, 0  ;;  %v1315_v21 = vsel %vm1314_vm1, %v1313_v15, 0 }
  0x11   :  { %v1472_v20 = vand.u32 31, %v1470_v17  ;;  %v2776_v22 = vshrl.u32 %v1470_v17, 5  ;;  %v2778_v23 = vand.u32 31, %v1315_v21  ;;  %v2808_v54 = vshrl.u32 %v1315_v21, 5 }
  0x13   :  { %v1473_v25 = vsub.s32 32, %v1472_v20  ;;  %v1475_v27 = vshll.u32 %v2727_v26, %v1472_v20  ;;  %v1478_v29 = vshll.u32 %v2728_v28, %v1472_v20  ;;  %v1481_v31 = vshll.u32 %v2729_v30, %v1472_v20 }
  0x14   :  { %v1484_v33 = vshll.u32 %v2730_v32, %v1472_v20  ;;  %v1487_v35 = vshll.u32 %v2731_v34, %v1472_v20  ;;  %vm1490_vm2 = vcmp.lt.s32.totalorder %v2776_v22, 1  ;;  %vm1493_vm3 = vcmp.lt.s32.totalorder %v2776_v22, 4 }
  0x15   :  { %v1476_v38 = vshrl.u32 %v2728_v28, %v1473_v25  ;;  %v1479_v39 = vshrl.u32 %v2729_v30, %v1473_v25  ;;  %v1482_v40 = vshrl.u32 %v2730_v32, %v1473_v25  ;;  %v1485_v42 = vshrl.u32 %v2731_v34, %v1473_v25 }
  0x16   :  { %v1488_v44 = vshrl.u32 %v2732_v43, %v1473_v25  ;;  %v2799_v48 = vsub.s32 32, %v2778_v23  ;;  %v1474_v49 = vshrl.u32 %v2727_v26, %v1473_v25  ;;  %vm1492_vm4 = vcmp.lt.s32.totalorder %v2776_v22, 3 }
  0x17   :  { %v1477_v45 = vor.u32 %v1476_v38, %v1475_v27  ;;  %v1480_v46 = vor.u32 %v1479_v39, %v1478_v29  ;;  %v1483_v47 = vor.u32 %v1482_v40, %v1481_v31  ;;  %v1486_v50 = vor.u32 %v1485_v42, %v1484_v33 }
  0x18   :  { %v1489_v51 = vor.u32 %v1488_v44, %v1487_v35  ;;  %vm1491_vm5 = vcmp.lt.s32.totalorder %v2776_v22, 2  ;;  %v1320_v57 = vshll.u32 %v2727_v26, %v2778_v23  ;;  %v1323_v58 = vshll.u32 %v2728_v28, %v2778_v23 }
  0x19   :  { %v1498_v52 = vsel %vm1490_vm2, %v1477_v45, %v1480_v46  ;;  %v1502_v53 = vsel %vm1490_vm2, %v1480_v46, %v1483_v47  ;;  %v1499_v55 = vsel %vm1493_vm3, %v1486_v50, 920167782  ;;  %v1495_v59 = vsel %vm1493_vm3, %v1483_v47, 2102212464 }
  0x1a   :  { %v1503_v56 = vsel %vm1493_vm3, %v1489_v51, 1326507024  ;;  %v1500_v60 = vsel %vm1492_vm4, %v1483_v47, %v1499_v55  ;;  %v1321_v62 = vshrl.u32 %v2728_v28, %v2799_v48  ;;  %v1494_v63 = vsel %vm1490_vm2, %v1474_v49, %v1477_v45 }
  0x1b   :  { %v1504_v61 = vsel %vm1492_vm4, %v1486_v50, %v1503_v56  ;;  %v1501_v3 = vsel %vm1491_vm5, %v1498_v52, %v1500_v60  ;;  %v1324_v6 = vshrl.u32 %v2729_v30, %v2799_v48  ;;  %v1496_v12 = vsel %vm1492_vm4, %v1480_v46, %v1495_v59 }
  0x1c   :  { %v1505_v5 = vsel %vm1491_vm5, %v1502_v53, %v1504_v61  ;;  %v1531_v10 = vand.u32 65535, %v1501_v3  ;;  %v1532_v11 = vshrl.u32 %v1501_v3, 16  ;;  %v2836_v13 = vor.u32 %v1321_v62, %v1320_v57 }
  0x1d   :  { %v1509_v7 = vand.u32 65535, %v1505_v5  ;;  %v1510_v8 = vshrl.u32 %v1505_v5, 16  ;;  %v2838_v14 = vor.u32 %v1324_v6, %v1323_v58  ;;  %v1326_v15 = vshll.u32 %v2729_v30, %v2778_v23 }
  0x1e   :  { %v1327_v20 = vshrl.u32 %v2730_v32, %v2799_v48  ;;  %v1533_v25 = vmul.u32 %v1531_v10, %v1507_v36  ;;  %v1534_v27 = vmul.u32 %v1532_v11, %v1507_v36  ;;  %v1535_v29 = vmul.u32 %v1531_v10, %v1508_v41 }
  0x1f   :  { %v1511_v16 = vmul.u32 %v1509_v7, %v1507_v36  ;;  %v1512_v17 = vmul.u32 %v1510_v8, %v1507_v36  ;;  %v1513_v19 = vmul.u32 %v1509_v7, %v1508_v41  ;;  %v1514_v21 = vmul.u32 %v1510_v8, %v1508_v41 }
  0x20   :  { %v1536_v38 = vmul.u32 %v1532_v11, %v1508_v41  ;;  %v1537_v40 = vshll.u32 %v1534_v27, 16  ;;  %v1538_v42 = vshrl.u32 %v1534_v27, 16  ;;  %v1539_v44 = vshll.u32 %v1535_v29, 16 }
  0x21   :  { %v1515_v31 = vshll.u32 %v1512_v17, 16  ;;  %v1516_v33 = vshrl.u32 %v1512_v17, 16  ;;  %v1517_v35 = vshll.u32 %v1513_v19, 16  ;;  %v1518_v39 = vshrl.u32 %v1513_v19, 16 }
  0x22   :  { %v1540_v46 = vshrl.u32 %v1535_v29, 16  ;;  %v1329_v47 = vshll.u32 %v2730_v32, %v2778_v23  ;;  %v2733_v49 = vmov 0   ;;  %vm1541_vm7 = vc.u32 %v1533_v25, %v1537_v40 }
  0x23   :  { %vm1519_vm6 = vc.u32 %v1511_v16, %v1515_v31  ;;  %v1521_v45 = vadd.s32 %v1515_v31, %v1511_v16  ;;  %v1543_v36 = vadd.s32 %v1537_v40, %v1533_v25  ;;  %v1330_v51 = vshrl.u32 %v2731_v34, %v2799_v48 }
  0x24   :  { %v1520_v50 = vsel %vm1519_vm6, 1, %v2733_v49  ;;  %v1542_v41 = vsel %vm1541_vm7, 1, %v2733_v49  ;;  %v1332_v53 = vshll.u32 %v2731_v34, %v2778_v23  ;;  %v1328_v57 = vor.u32 %v1327_v20, %v1326_v15 }
  0x25   :  { %v1522_v52 = vadd.s32 %v1520_v50, %v1514_v21  ;;  %vm1523_vm8 = vc.u32 %v1521_v45, %v1517_v35  ;;  %v1544_v56 = vadd.s32 %v1542_v41, %v1536_v38  ;;  %vm1545_vm9 = vc.u32 %v1543_v36, %v1539_v44 }
  0x26   :  { %v1524_v55 = vsel %vm1523_vm8, 1, %v2733_v49  ;;  %v1546_v59 = vsel %vm1545_vm9, 1, %v2733_v49  ;;  %v1331_v60 = vor.u32 %v1330_v51, %v1329_v47  ;;  %v1333_v61 = vshrl.u32 %v2732_v43, %v2799_v48 }
  0x27   :  { %v1526_v58 = vadd.s32 %v1524_v55, %v1522_v52  ;;  %v2856_v62 = vadd.s32 %v1543_v36, %v1539_v44  ;;  %v1548_v3 = vadd.s32 %v1546_v59, %v1544_v56  ;;  %vm1335_vm10 = vcmp.lt.s32.totalorder %v2808_v54, 1 }
  0x28   :  { %vm1337_vm11 = vcmp.lt.s32.totalorder %v2808_v54, 3  ;;  %v1334_v5 = vor.u32 %v1333_v61, %v1332_v53  ;;  %vm1336_vm12 = vcmp.lt.s32.totalorder %v2808_v54, 2  ;;  %vm1338_vm13 = vcmp.lt.s32.totalorder %v2808_v54, 4 }
  0x29   :  { %v1527_v23 = vadd.s32 %v1526_v58, %v1516_v33  ;;  %v1497_v6 = vsel %vm1491_vm5, %v1494_v63, %v1496_v12  ;;  %v1549_v7 = vadd.s32 %v1548_v3, %v1538_v42  ;;  %v1343_v8 = vsel %vm1335_vm10, %v2836_v13, %v2838_v14 }
  0x2a   :  { %v1344_v10 = vsel %vm1338_vm13, %v1331_v60, 920167782  ;;  %v1347_v16 = vsel %vm1335_vm10, %v2838_v14, %v1328_v57  ;;  %v1352_v22 = vand.u32 65535, %v2788_v37  ;;  %v1348_v17 = vsel %vm1338_vm13, %v1334_v5, 1326507024 }
  0x2b   :  { %v2870_v11 = vadd.s32 %v1527_v23, %v1518_v39  ;;  %v1345_v15 = vsel %vm1337_vm11, %v1328_v57, %v1344_v10  ;;  %v1550_v63 = vadd.s32 %v1549_v7, %v1540_v46  ;;  %v1353_v19 = vshrl.u32 %v2788_v37, 16 }
  0x2c   :  { %v1346_v12 = vsel %vm1336_vm12, %v1343_v8, %v1345_v15  ;;  %v1551_v20 = vmul.u32 %v2774_v18, %v1497_v6  ;;  %v1349_v21 = vsel %vm1337_vm11, %v1331_v60, %v1348_v17  ;;  %v2616_v33 = vadd.s32 4294967169, %v2780_v24 }
  0x2d   :  { %vm1553_vm14 = vc.u32 %v2870_v11, %v2856_v62  ;;  %v1376_v25 = vand.u32 65535, %v1346_v12  ;;  %v1554_v27 = vadd.s32 1, %v1550_v63  ;;  %v1350_v29 = vsel %vm1336_vm12, %v1347_v16, %v1349_v21 }
  0x2e   :  { %v1377_v31 = vshrl.u32 %v1346_v12, 16  ;;  %v1354_v35 = vand.u32 65535, %v1350_v29  ;;  %v1355_v38 = vshrl.u32 %v1350_v29, 16  ;;  %v1319_v18 = vshrl.u32 %v2727_v26, %v2799_v48 }
  0x2f   :  { %v1555_v39 = vsel %vm1553_vm14, %v1554_v27, %v1550_v63  ;;  %v1380_v42 = vmul.u32 %v1376_v25, %v1353_v19  ;;  %v1378_v47 = vmul.u32 %v1376_v25, %v1352_v22  ;;  %v673_v51 = vadd.s32 1, %v2616_v33 }
  0x30   :  { %v1379_v40 = vmul.u32 %v1377_v31, %v1352_v22  ;;  %v1556_v44 = vadd.s32 %v1555_v39, %v1551_v20  ;;  %v1356_v45 = vmul.u32 %v1354_v35, %v1352_v22  ;;  %v1357_v46 = vmul.u32 %v1355_v38, %v1352_v22 }
  0x31   :  { %v1358_v50 = vmul.u32 %v1354_v35, %v1353_v19  ;;  %v1340_v41 = vsel %vm1338_vm13, %v1328_v57, 2102212464  ;;  %v1359_v24 = vmul.u32 %v1355_v38, %v1353_v19  ;;  %v1339_v55 = vsel %vm1335_vm10, %v1319_v18, %v2836_v13 }
  0x32   :  { %v1382_v36 = vshll.u32 %v1379_v40, 16  ;;  %v1557_v52 = vadd.s32 536870912, %v1556_v44  ;;  %v1360_v53 = vshll.u32 %v1357_v46, 16  ;;  %v1381_v56 = vmul.u32 %v1377_v31, %v1353_v19 }
  0x33   :  { %v1362_v48 = vshll.u32 %v1358_v50, 16  ;;  %v1384_v58 = vshll.u32 %v1380_v42, 16  ;;  %v1341_v61 = vsel %vm1337_vm11, %v2838_v14, %v1340_v41  ;;  %v1361_v13 = vshrl.u32 %v1357_v46, 16 }
  0x34   :  { %v2898_v59 = vshrl.u32 %v1557_v52, 30  ;;  %vm1364_vm15 = vc.u32 %v1356_v45, %v1360_v53  ;;  %v1366_v60 = vadd.s32 %v1360_v53, %v1356_v45  ;;  %vm1386_vm0 = vc.u32 %v1378_v47, %v1382_v36 }
  0x35   :  { %v1365_v57 = vsel %vm1364_vm15, 1, %v2733_v49  ;;  %v1387_v3 = vsel %vm1386_vm0, 1, %v2733_v49  ;;  %v1388_v23 = vadd.s32 %v1382_v36, %v1378_v47  ;;  %v1383_v8 = vshrl.u32 %v1379_v40, 16 }
  0x36   :  { %v1559_v5 = vshll.u32 %v2898_v59, 30  ;;  %v1367_v6 = vadd.s32 %v1365_v57, %v1359_v24  ;;  %vm1368_vm1 = vc.u32 %v1366_v60, %v1362_v48  ;;  %v1389_v10 = vadd.s32 %v1387_v3, %v1381_v56 }
  0x37   :  { %v1369_v7 = vsel %vm1368_vm1, 1, %v2733_v49  ;;  %vm1390_vm2 = vc.u32 %v1388_v23, %v1384_v58  ;;  %v1363_v16 = vshrl.u32 %v1358_v50, 16  ;;  %v1385_v63 = vshrl.u32 %v1380_v42, 16 }
  0x38   :  { %v1560_v15 = vsub.s32 %v1556_v44, %v1559_v5  ;;  %v1371_v22 = vadd.s32 %v1369_v7, %v1367_v6  ;;  %v1391_v14 = vsel %vm1390_vm2, 1, %v2733_v49  ;;  %v2908_v12 = vadd.s32 %v1388_v23, %v1384_v58 }
  0x39   :  { %v1393_v17 = vadd.s32 %v1391_v14, %v1389_v10  ;;  %vm674_vm3 = vcmp.gt.s32.totalorder %v673_v51, 0  ;;  %v1342_v25 = vsel %vm1336_vm12, %v1339_v55, %v1341_v61  ;;  %v663_v39 = vand.u32 2147483647, %v2769_v9 }
  0x3a   :  { %vm1561_vm4 = vcmp.lt.s32.totalorder %v1560_v15, 0  ;;  %v1562_v19 = vsub.s32 0, %v1560_v15  ;;  %v1372_v20 = vadd.s32 %v1371_v22, %v1361_v13  ;;  %v675_v21 = vsel %vm674_vm3, %v673_v51, 0 }
  0x3b   :  { %v1394_v27 = vadd.s32 %v1393_v17, %v1383_v8  ;;  %v677_v33 = vand.u32 31, %v675_v21  ;;  %v1396_v18 = vmul.u32 %v2788_v37, %v1342_v25  ;;  %vm1460_vm6 = vcmp.lt.s32.totalorder %v2758_v0, 0 }
  0x3c   :  { %v1563_v29 = vsel %vm1561_vm4, %v1562_v19, %v1560_v15  ;;  %v2912_v31 = vadd.s32 %v1372_v20, %v1363_v16  ;;  %v1552_v44 = vadd.s32 %v2856_v62, %v2870_v11  ;;  %v670_v46 = vand.u32 8388607, %v663_v39 }
  0x3d   :  { %v1564_v35 = vclz %v1563_v29  ;;  %v1395_v38 = vadd.s32 %v1394_v27, %v1385_v63  ;;  %v2919_v54 = vsub.s32 32, %v677_v33  ;;  %vm2927_vm8 = vcmp.le.f32.partialorder %v1458_v2, 0.7853982 }
  0x3e   :  { %vm1398_vm5 = vc.u32 %v2912_v31, %v2908_v12  ;;  %v1582_v50 = vsub.s32 4, %v2898_v59  ;;  %v683_v51 = vshll.u32 %v2728_v28, %v677_v33  ;;  %v686_v11 = vshll.u32 %v2729_v30, %v677_v33 }
  0x3f   :  { %v2632_v40 = vadd.s32 4294967294, %v1564_v35  ;;  %v1399_v42 = vadd.s32 1, %v1395_v38  ;;  %v684_v53 = vshrl.u32 %v2729_v30, %v2919_v54  ;;  %v687_v2 = vshrl.u32 %v2730_v32, %v2919_v54 }
  0x40   :  { %v689_v55 = vshll.u32 %v2730_v32, %v677_v33  ;;  %v690_v58 = vshrl.u32 %v2731_v34, %v2919_v54  ;;  %v692_v60 = vshll.u32 %v2731_v34, %v677_v33  ;;  %v671_v57 = vor.u32 8388608, %v670_v46 }
  0x41   :  { %vm2633_vm7 = vcmp.lt.s32.totalorder %v2632_v40, 0  ;;  %v1400_v45 = vsel %vm1398_vm5, %v1399_v42, %v1395_v38  ;;  %v2944_v3 = vshrl.u32 %v675_v21, 5  ;;  %v693_v23 = vshrl.u32 %v2732_v43, %v2919_v54 }
  0x42   :  { %v1567_v47 = vsel %vm2633_vm7, 0, %v2632_v40  ;;  %v1401_v36 = vadd.s32 %v1400_v45, %v1396_v18  ;;  %v1583_v6 = vsel %vm1460_vm6, %v1582_v50, %v2898_v59  ;;  %v680_v7 = vshll.u32 %v2727_v26, %v677_v33 }
  0x43   :  { %v1568_v52 = vsub.s32 32, %v1567_v47  ;;  %v1569_v41 = vshll.u32 %v1560_v15, %v1567_v47  ;;  %v1572_v62 = vsub.s32 4294967266, %v1567_v47  ;;  %v681_v10 = vshrl.u32 %v2728_v28, %v2919_v54 }
  0x44   :  { %v1402_v24 = vadd.s32 536870912, %v1401_v36  ;;  %v2955_v15 = vor.u32 %v684_v53, %v683_v51  ;;  %v2957_v16 = vor.u32 %v687_v2, %v686_v11  ;;  %v691_v63 = vor.u32 %v690_v58, %v689_v55 }
  0x45   :  { %v1570_v48 = vshrl.u32 %v1552_v44, %v1568_v52  ;;  %v1573_v56 = vadd.s32 127, %v1572_v62  ;;  %v694_v17 = vor.u32 %v693_v23, %v692_v60  ;;  %vm695_vm9 = vcmp.lt.s32.totalorder %v2944_v3, 1 }
  0x46   :  { %v2942_v61 = vshrl.u32 %v1402_v24, 30  ;;  %vm698_vm10 = vcmp.lt.s32.totalorder %v2944_v3, 4  ;;  %v2963_v59 = vshll.u32 %v671_v57, 8  ;;  %v2967_v21 = vsel %vm2927_vm8, 0, %v1583_v6 }
  0x47   :  { %v1571_v5 = vor.u32 %v1570_v48, %v1569_v41  ;;  %v1574_v13 = vshll.u32 %v1573_v56, 23  ;;  %vm697_vm11 = vcmp.lt.s32.totalorder %v2944_v3, 3  ;;  %v682_v27 = vor.u32 %v681_v10, %v680_v7 }
  0x48   :  { %v1404_v8 = vshll.u32 %v2942_v61, 30  ;;  %vm696_vm13 = vcmp.lt.s32.totalorder %v2944_v3, 2  ;;  %v704_v33 = vsel %vm698_vm10, %v691_v63, 920167782  ;;  %v707_v35 = vsel %vm695_vm9, %v2955_v15, %v2957_v16 }
  0x49   :  { %v1575_v22 = vor.u32 4788187, %v1574_v13  ;;  %v1578_v14 = vcvt.s32.f32 %v1571_v5  ;;  %v708_v38 = vsel %vm698_vm10, %v694_v17, 1326507024  ;;  %v1602_v18 = vadd.s32 3, %v2967_v21 }
  0x4a   :  { %v2959_v19 = vsub.s32 %v1401_v36, %v1404_v8  ;;  %v709_v42 = vsel %vm697_vm11, %v691_v63, %v708_v38  ;;  %v712_v44 = vand.u32 65535, %v2963_v59  ;;  %v2989_v50 = vshrl.u32 %v2963_v59, 16 }
  0x4b   :  { %v1576_v20 = vand.u32 2147483647, %v1575_v22  ;;  %v710_v47 = vsel %vm696_vm13, %v707_v35, %v709_v42  ;;  %v703_v36 = vsel %vm695_vm9, %v682_v27, %v2955_v15  ;;  %v705_v51 = vsel %vm697_vm11, %v2957_v16, %v704_v33 }
  0x4c   :  { %vm1406_vm12 = vcmp.lt.s32.totalorder %v2959_v19, 0  ;;  %v1407_v25 = vsub.s32 0, %v2959_v19  ;;  %v714_v52 = vand.u32 65535, %v710_v47  ;;  %v715_v41 = vshrl.u32 %v710_v47, 16 }
  0x4d   :  { %v1579_v29 = vmul.f32 %v1578_v14, %v1576_v20  ;;  %v1397_v11 = vadd.s32 %v2908_v12, %v2912_v31  ;;  %v3002_v53 = vmul.f32 2.0, %v2758_v0  ;;  %v3009_v55 = vand.u32 3, %v1602_v18 }
  0x4e   :  { %v1408_v40 = vsel %vm1406_vm12, %v1407_v25, %v2959_v19  ;;  %v679_v48 = vshrl.u32 %v2727_v26, %v2919_v54  ;;  %v3013_v56 = vmul.u32 %v715_v41, %v712_v44  ;;  %v706_v12 = vsel %vm696_vm13, %v703_v36, %v705_v51 }
  0x4f   :  { %v1580_v45 = vxor.u32 2147483648, %v1579_v29  ;;  %v1409_v46 = vclz %v1408_v40  ;;  %v716_v31 = vmul.u32 %v714_v52, %v712_v44  ;;  %vm1305_vm15 = vcmp.lt.s32.totalorder %v2760_v1, 0 }
  0x50   :  { %v1427_v60 = vsub.s32 4, %v2942_v61  ;;  %v3022_v57 = vmul.u32 %v714_v52, %v2989_v50  ;;  %v720_v54 = vshll.u32 %v3013_v56, 16  ;;  %v719_v8 = vmul.u32 %v715_v41, %v2989_v50 }
  0x51   :  { %v1581_v62 = vsel %vm1460_vm6, %v1580_v45, %v1579_v29  ;;  %v2629_v24 = vadd.s32 4294967294, %v1409_v46  ;;  %v736_v10 = vand.u32 65535, %v706_v12  ;;  %v737_v22 = vshrl.u32 %v706_v12, 16 }
  0x52   :  { %v3007_v2 = vsel %vm2927_vm8, %v2758_v0, %v1581_v62  ;;  %vm3029_vm0 = vcmp.le.f32.partialorder %v1303_v4, 0.7853982  ;;  %vm724_vm1 = vc.u32 %v716_v31, %v720_v54  ;;  %vm1608_vm2 = vcmp.eq.s32.totalorder %v3009_v55, 2 }
  0x53   :  { %v1586_v58 = vmul.f32 %v3007_v2, %v3007_v2  ;;  %vm2630_vm14 = vcmp.lt.s32.totalorder %v2629_v24, 0  ;;  %v700_v29 = vsel %vm698_vm10, %v2957_v16, 2102212464  ;;  %v722_v33 = vshll.u32 %v3022_v57, 16 }
  0x54   :  { %v1412_v37 = vsel %vm2630_vm14, 0, %v2629_v24  ;;  %v725_v18 = vsel %vm724_vm1, 1, %v2733_v49  ;;  %vm1605_vm3 = vcmp.eq.s32.totalorder %v3009_v55, 0  ;;  %v726_v42 = vadd.s32 %v720_v54, %v716_v31 }
  0x55   :  { %v1587_v23 = vmul.f32 -0.001358992, %v1586_v58  ;;  %v1594_v5 = vmul.f32 -0.00019511016, %v1586_v58  ;;  %v1413_v13 = vsub.s32 32, %v1412_v37  ;;  %v1414_v6 = vshll.u32 %v2959_v19, %v1412_v37 }
  0x56   :  { %v1417_v7 = vsub.s32 4294967266, %v1412_v37  ;;  %v699_v19 = vsel %vm695_vm9, %v679_v48, %v682_v27  ;;  %v738_v45 = vmul.u32 %v736_v10, %v712_v44  ;;  %v739_v46 = vmul.u32 %v737_v22, %v712_v44 }
  0x57   :  { %v1588_v14 = vadd.f32 0.041655596, %v1587_v23  ;;  %v1595_v63 = vadd.f32 0.008332121, %v1594_v5  ;;  %v1415_v20 = vshrl.u32 %v1397_v11, %v1413_v13  ;;  %vm1604_vm4 = vcmp.lt.s32.totalorder %v3009_v55, 2 }
  0x58   :  { %v1418_v25 = vadd.s32 127, %v1417_v7  ;;  %v727_v27 = vadd.s32 %v725_v18, %v719_v8  ;;  %v740_v16 = vmul.u32 %v736_v10, %v2989_v50  ;;  %vm1601_vm5 = vweird.f32 %v2758_v0 }
  0x59   :  { %v1589_v35 = vmul.f32 %v1588_v14, %v1586_v58  ;;  %v1596_v38 = vmul.f32 %v1595_v63, %v1586_v58  ;;  %v1416_v4 = vor.u32 %v1415_v20, %v1414_v6  ;;  %vm728_vm6 = vc.u32 %v726_v42, %v722_v33 }
  0x5a   :  { %v1419_v40 = vshll.u32 %v1418_v25, 23  ;;  %v742_v41 = vshll.u32 %v739_v46, 16  ;;  %v1428_v24 = vsel %vm1305_vm15, %v1427_v60, %v2942_v61  ;;  %v701_v44 = vsel %vm697_vm11, %v2955_v15, %v700_v29 }
  0x5b   :  { %v1590_v47 = vadd.f32 -0.4999988, %v1589_v35  ;;  %v1597_v36 = vadd.f32 -0.16666654, %v1596_v38  ;;  %v1423_v52 = vcvt.s32.f32 %v1416_v4  ;;  %v721_v12 = vshrl.u32 %v3013_v56, 16 }
  0x5c   :  { %v1420_v51 = vor.u32 4788187, %v1419_v40  ;;  %v729_v31 = vsel %vm728_vm6, 1, %v2733_v49  ;;  %v741_v37 = vmul.u32 %v737_v22, %v2989_v50  ;;  %v744_v13 = vshll.u32 %v740_v16, 16 }
  0x5d   :  { %v1591_v62 = vmul.f32 %v1590_v47, %v1586_v58  ;;  %v1598_v11 = vmul.f32 %v1597_v36, %v1586_v58  ;;  %v731_v5 = vadd.s32 %v729_v31, %v727_v27  ;;  %v3056_v6 = vsel %vm3029_vm0, 0, %v1428_v24 }
  0x5e   :  { %v1421_v48 = vand.u32 2147483647, %v1420_v51  ;;  %vm746_vm7 = vc.u32 %v738_v45, %v742_v41  ;;  %v748_v61 = vadd.s32 %v742_v41, %v738_v45  ;;  %v723_v56 = vshrl.u32 %v3022_v57, 16 }
  0x5f   :  { %v1592_v54 = vadd.f32 1.0, %v1591_v62  ;;  %v1599_v23 = vadd.f32 1.0, %v1598_v11  ;;  %v747_v7 = vsel %vm746_vm7, 1, %v2733_v49  ;;  %v732_v50 = vadd.s32 %v731_v5, %v721_v12 }
  0x60   :  { %v1424_v58 = vmul.f32 %v1423_v52, %v1421_v48  ;;  %v749_v10 = vadd.s32 %v747_v7, %v741_v37  ;;  %vm750_vm8 = vc.u32 %v748_v61, %v744_v13  ;;  %v702_v63 = vsel %vm696_vm13, %v699_v19, %v701_v44 }
  0x61   :  { %v1600_v15 = vmul.f32 %v1599_v23, %v3007_v2  ;;  %v1609_v60 = vxor.u32 2147483648, %v1592_v54  ;;  %v743_v20 = vshrl.u32 %v739_v46, 16  ;;  %v1922_v25 = vand.u32 3, %v2967_v21 }
  0x62   :  { %v1425_v8 = vxor.u32 2147483648, %v1424_v58  ;;  %v751_v57 = vsel %vm750_vm8, 1, %v2733_v49  ;;  %v821_v29 = vand.u32 2139095040, %v3002_v53  ;;  %v745_v38 = vshrl.u32 %v740_v16, 16 }
  0x63   :  { %v1606_v22 = vxor.u32 2147483648, %v1600_v15  ;;  %v1610_v14 = vsel %vm1608_vm2, %v1609_v60, %v1600_v15  ;;  %v753_v3 = vadd.s32 %v751_v57, %v749_v10  ;;  %v3077_v18 = vadd.s32 %v732_v50, %v723_v56 }
  0x64   :  { %v1426_v2 = vsel %vm1305_vm15, %v1425_v8, %v1424_v58  ;;  %v752_v21 = vadd.s32 %v748_v61, %v744_v13  ;;  %v1447_v42 = vadd.s32 3, %v3056_v6  ;;  %v756_v47 = vmul.u32 %v2963_v59, %v702_v63 }
  0x65   :  { %v1607_v33 = vsel %vm1605_vm3, %v1592_v54, %v1606_v22  ;;  %v1429_v35 = vsel %vm3029_vm0, %v2760_v1, %v1426_v2  ;;  %v754_v45 = vadd.s32 %v753_v3, %v743_v20  ;;  %v822_v36 = vshrl.u32 %v821_v29, 23 }
  0x66   :  { %v1611_v19 = vsel %vm1604_vm4, %v1607_v33, %v1610_v14  ;;  %v1431_v4 = vmul.f32 %v1429_v35, %v1429_v35  ;;  %vm1924_vm9 = vcmp.eq.s32.totalorder %v1922_v25, 0  ;;  %vm1927_vm10 = vcmp.eq.s32.totalorder %v1922_v25, 2 }
  0x67   :  { %v1612_v40 = vsel %vm1601_vm5, nan, %v1611_v19  ;;  %v755_v55 = vadd.s32 %v754_v45, %v745_v38  ;;  %v818_v27 = vand.u32 2147483647, %v3002_v53  ;;  %vm758_vm11 = vc.u32 %v3077_v18, %v752_v21 }
  0x68   :  { %1617 = vrot.lane.b32.xlu1 %v1612_v40, %s2734_s0  ;;  %v1432_v17 = vmul.f32 -0.001358992, %v1431_v4  ;;  %v1439_v46 = vmul.f32 -0.00019511016, %v1431_v4  ;;  %v2619_v52 = vadd.s32 4294967169, %v822_v36  ;;  %v1448_v41 = vand.u32 3, %v1447_v42 }
  0x69   :  { %v759_v62 = vadd.s32 1, %v755_v55  ;;  %vm1923_vm12 = vcmp.lt.s32.totalorder %v1922_v25, 2  ;;  %v1926_v48 = vsel %vm1924_vm9, %v1592_v54, %v1606_v22  ;;  %v1929_v12 = vsel %vm1927_vm10, %v1609_v60, %v1600_v15 }
  0x6a   :  { %v1433_v16 = vadd.f32 0.041655596, %v1432_v17  ;;  %v1440_v51 = vadd.f32 0.008332121, %v1439_v46  ;;  %v828_v44 = vadd.s32 1, %v2619_v52  ;;  %vm1446_vm14 = vweird.f32 %v2760_v1 }
  0x6b   :  { %v760_v59 = vsel %vm758_vm11, %v759_v62, %v755_v55  ;;  %v825_v31 = vand.u32 8388607, %v818_v27  ;;  %v3090_v58 = vmul.f32 4.0, %v2760_v1  ;;  %vm1449_vm15 = vcmp.lt.s32.totalorder %v1448_v41, 2 }
  0x6c   :  { %v1434_v11 = vmul.f32 %v1433_v16, %v1431_v4  ;;  %v1441_v24 = vmul.f32 %v1440_v51, %v1431_v4  ;;  %v761_v5 = vadd.s32 %v760_v59, %v756_v47  ;;  %vm829_vm13 = vcmp.gt.s32.totalorder %v828_v44, 0 }
  0x6d   :  { %v830_v13 = vsel %vm829_vm13, %v828_v44, 0  ;;  %vm1450_vm0 = vcmp.eq.s32.totalorder %v1448_v41, 0  ;;  %vm1453_vm1 = vcmp.eq.s32.totalorder %v1448_v41, 2  ;;  %v1930_v54 = vsel %vm1923_vm12, %v1926_v48, %v1929_v12 }
  0x6e   :  { %v1435_v37 = vadd.f32 -0.4999988, %v1434_v11  ;;  %v1442_v23 = vadd.f32 -0.16666654, %v1441_v24  ;;  %v762_v7 = vadd.s32 536870912, %v761_v5  ;;  %v832_v15 = vand.u32 31, %v830_v13 }
  0x6f   :  { %v826_v10 = vor.u32 8388608, %v825_v31  ;;  %v3097_v22 = vshrl.u32 %v830_v13, 5  ;;  %v32_v20 = vand.u32 2139095040, %v3090_v58  ;;  %v757_v40 = vadd.s32 %v752_v21, %v3077_v18 }
  0x70   :  { %v1436_v61 = vmul.f32 %v1435_v37, %v1431_v4  ;;  %v1443_v56 = vmul.f32 %v1442_v23, %v1431_v4  ;;  %v3095_v50 = vshrl.u32 %v762_v7, 30  ;;  %v833_v14 = vsub.s32 32, %v832_v15 }
  0x71   :  { %v835_v63 = vshll.u32 %v2727_v26, %v832_v15  ;;  %v838_v29 = vshll.u32 %v2728_v28, %v832_v15  ;;  %v841_v3 = vshll.u32 %v2729_v30, %v832_v15  ;;  %vm850_vm2 = vcmp.lt.s32.totalorder %v3097_v22, 1 }
  0x72   :  { %v3093_v60 = vadd.f32 1.0, %v1436_v61  ;;  %v1444_v8 = vadd.f32 1.0, %v1443_v56  ;;  %v764_v25 = vshll.u32 %v3095_v50, 30  ;;  %v836_v33 = vshrl.u32 %v2728_v28, %v833_v14 }
  0x73   :  { %v839_v38 = vshrl.u32 %v2729_v30, %v833_v14  ;;  %v842_v19 = vshrl.u32 %v2730_v32, %v833_v14  ;;  %v3119_v17 = vshll.u32 %v826_v10, 8  ;;  %v33_v46 = vshrl.u32 %v32_v20, 23 }
  0x74   :  { %v3101_v2 = vmul.f32 %v1444_v8, %v1429_v35  ;;  %v1454_v57 = vxor.u32 2147483648, %v3093_v60  ;;  %v3116_v42 = vsub.s32 %v761_v5, %v764_v25  ;;  %v837_v45 = vor.u32 %v836_v33, %v835_v63 }
  0x75   :  { %v840_v55 = vor.u32 %v839_v38, %v838_v29  ;;  %v843_v21 = vor.u32 %v842_v19, %v841_v3  ;;  %v844_v16 = vshll.u32 %v2730_v32, %v832_v15  ;;  %v845_v51 = vshrl.u32 %v2731_v34, %v833_v14 }
  0x76   :  { %v1451_v4 = vxor.u32 2147483648, %v3101_v2  ;;  %v1455_v35 = vsel %vm1453_vm1, %v1454_v57, %v3101_v2  ;;  %vm766_vm3 = vcmp.lt.s32.totalorder %v3116_v42, 0  ;;  %v767_v36 = vsub.s32 0, %v3116_v42 }
  0x77   :  { %v847_v11 = vshll.u32 %v2731_v34, %v832_v15  ;;  %v848_v24 = vshrl.u32 %v2732_v43, %v833_v14  ;;  %v1931_v41 = vsel %vm1601_vm5, nan, %v1930_v54  ;;  %vm665_vm4 = vcmp.lt.s32.totalorder %v2769_v9, 0 }
  0x78   :  { %v1452_v47 = vsel %vm1450_vm0, %v3093_v60, %v1451_v4  ;;  %v768_v62 = vsel %vm766_vm3, %v767_v36, %v3116_v42  ;;  %v846_v48 = vor.u32 %v845_v51, %v844_v16  ;;  %vm852_vm6 = vcmp.lt.s32.totalorder %v3097_v22, 3 }
  0x79   :  { %v1456_v18 = vsel %vm1449_vm15, %v1452_v47, %v1455_v35  ;;  %v769_v44 = vclz %v768_v62  ;;  %v849_v12 = vor.u32 %v848_v24, %v847_v11  ;;  %vm851_vm7 = vcmp.lt.s32.totalorder %v3097_v22, 2 }
  0x7a   :  { %v1457_v52 = vsel %vm1446_vm14, nan, %v1456_v18  ;;  %vm853_vm8 = vcmp.lt.s32.totalorder %v3097_v22, 4  ;;  %v858_v59 = vsel %vm850_vm2, %v837_v45, %v840_v55  ;;  %v867_v0 = vand.u32 65535, %v3119_v17 }
  0x7b   :  { %1615 = vrot.lane.b32.xlu0 %v1457_v52, %s2734_s0  ;;  %v2617_v31 = vadd.s32 4294967294, %v769_v44  ;;  %v859_v37 = vsel %vm853_vm8, %v846_v48, 920167782  ;;  %v29_v23 = vand.u32 2147483647, %v3090_v58  ;;  %v862_v13 = vsel %vm850_vm2, %v840_v55, %v843_v21 }
  0x7c   :  { %v860_v5 = vsel %vm852_vm6, %v843_v21, %v859_v37  ;;  %v863_v61 = vsel %vm853_vm8, %v849_v12, 1326507024  ;;  %v2604_v56 = vadd.s32 4294967169, %v33_v46  ;;  %v787_v7 = vsub.s32 4, %v3095_v50 }
  0x7d   :  { %vm2618_vm5 = vcmp.lt.s32.totalorder %v2617_v31, 0  ;;  %v861_v54 = vsel %vm851_vm7, %v858_v59, %v860_v5  ;;  %v868_v15 = vshrl.u32 %v3119_v17, 16  ;;  %v834_v10 = vshrl.u32 %v2727_v26, %v833_v14 }
  0x7e   :  { %v772_v8 = vsel %vm2618_vm5, 0, %v2617_v31  ;;  %v864_v63 = vsel %vm852_vm6, %v846_v48, %v863_v61  ;;  %v891_v20 = vand.u32 65535, %v861_v54  ;;  %v855_v3 = vsel %vm853_vm8, %v843_v21, 2102212464 }
  0x7f   :  { %v773_v25 = vsub.s32 32, %v772_v8  ;;  %v774_v29 = vshll.u32 %v3116_v42, %v772_v8  ;;  %v777_v33 = vsub.s32 4294967266, %v772_v8  ;;  %v865_v38 = vsel %vm851_vm7, %v862_v13, %v864_v63 }
  0x80   :  { %v869_v19 = vand.u32 65535, %v865_v38  ;;  %v3168_v35 = vand.u32 8388607, %v29_v23  ;;  %v39_v14 = vadd.s32 1, %v2604_v56  ;;  %v870_v36 = vshrl.u32 %v865_v38, 16 }
  0x81   :  { %v775_v46 = vshrl.u32 %v757_v40, %v773_v25  ;;  %v778_v47 = vadd.s32 127, %v777_v33  ;;  %v892_v42 = vshrl.u32 %v861_v54, 16  ;;  %v788_v18 = vsel %vm665_vm4, %v787_v7, %v3095_v50 }
  0x82   :  { %v854_v21 = vsel %vm850_vm2, %v834_v10, %v837_v45  ;;  %v873_v16 = vmul.u32 %v869_v19, %v868_v15  ;;  %v895_v51 = vmul.u32 %v891_v20, %v868_v15  ;;  %vm3178_vm9 = vcmp.le.f32.partialorder %v663_v39, 0.7853982 }
  0x83   :  { %1936 = vrot.lane.b32.xlu0 %v1931_v41, %s2735_s13  ;;  %v776_v62 = vor.u32 %v775_v46, %v774_v29  ;;  %v779_v40 = vshll.u32 %v778_v47, 23  ;;  %v871_v11 = vmul.u32 %v869_v19, %v867_v0  ;;  %v872_v24 = vmul.u32 %v870_v36, %v867_v0 }
  0x84   :  { %v856_v41 = vsel %vm852_vm6, %v840_v55, %v855_v3  ;;  %v874_v44 = vmul.u32 %v870_v36, %v868_v15  ;;  %v893_v50 = vmul.u32 %v891_v20, %v867_v0  ;;  %v894_v48 = vmul.u32 %v892_v42, %v867_v0 }
  0x85   :  { %v780_v12 = vor.u32 4788187, %v779_v40  ;;  %v783_v45 = vcvt.s32.f32 %v776_v62  ;;  %v875_v59 = vshll.u32 %v872_v24, 16  ;;  %v877_v31 = vshll.u32 %v873_v16, 16 }
  0x86   :  { %v878_v37 = vshrl.u32 %v873_v16, 16  ;;  %v896_v5 = vmul.u32 %v892_v42, %v868_v15  ;;  %v897_v39 = vshll.u32 %v894_v48, 16  ;;  %v899_v13 = vshll.u32 %v895_v51, 16 }
  0x87   :  { %v781_v61 = vand.u32 2147483647, %v780_v12  ;;  %v876_v56 = vshrl.u32 %v872_v24, 16  ;;  %vm879_vm10 = vc.u32 %v871_v11, %v875_v59  ;;  %v881_v7 = vadd.s32 %v875_v59, %v871_v11 }
  0x88   :  { %v880_v54 = vsel %vm879_vm10, 1, %v2733_v49  ;;  %vm901_vm11 = vc.u32 %v893_v50, %v897_v39  ;;  %v903_v8 = vadd.s32 %v897_v39, %v893_v50  ;;  %vm40_vm12 = vcmp.gt.s32.totalorder %v39_v14, 0 }
  0x89   :  { %v784_v55 = vmul.f32 %v783_v45, %v781_v61  ;;  %v882_v10 = vadd.s32 %v880_v54, %v874_v44  ;;  %vm883_vm13 = vc.u32 %v881_v7, %v877_v31  ;;  %v902_v0 = vsel %vm901_vm11, 1, %v2733_v49 }
  0x8a   :  { %v884_v63 = vsel %vm883_vm13, 1, %v2733_v49  ;;  %v898_v20 = vshrl.u32 %v894_v48, 16  ;;  %v904_v15 = vadd.s32 %v902_v0, %v896_v5  ;;  %vm905_vm15 = vc.u32 %v903_v8, %v899_v13 }
  0x8b   :  { %v785_v25 = vxor.u32 2147483648, %v784_v55  ;;  %v886_v29 = vadd.s32 %v884_v63, %v882_v10  ;;  %v906_v33 = vsel %vm905_vm15, 1, %v2733_v49  ;;  %v41_v38 = vsel %vm40_vm12, %v39_v14, 0 }
  0x8c   :  { %v857_v3 = vsel %vm851_vm7, %v854_v21, %v856_v41  ;;  %v900_v19 = vshrl.u32 %v895_v51, 16  ;;  %v908_v46 = vadd.s32 %v906_v33, %v904_v15  ;;  %v43_v47 = vand.u32 31, %v41_v38 }
  0x8d   :  { %v786_v36 = vsel %vm665_vm4, %v785_v25, %v784_v55  ;;  %v887_v42 = vadd.s32 %v886_v29, %v876_v56  ;;  %v3192_v16 = vadd.s32 %v903_v8, %v899_v13  ;;  %v37_v11 = vor.u32 8388608, %v3168_v35 }
  0x8e   :  { %v789_v62 = vsel %vm3178_vm9, %v2769_v9, %v786_v36  ;;  %v909_v40 = vadd.s32 %v908_v46, %v898_v20  ;;  %v3198_v14 = vsub.s32 32, %v43_v47  ;;  %v3202_v22 = vsel %vm3178_vm9, 0, %v788_v18 }
  0x8f   :  { %v791_v21 = vmul.f32 %v789_v62, %v789_v62  ;;  %v3204_v51 = vadd.s32 %v887_v42, %v878_v37  ;;  %v911_v24 = vmul.u32 %v3119_v17, %v857_v3  ;;  %v3207_v44 = vshrl.u32 %v41_v38, 5 }
  0x90   :  { %v910_v41 = vadd.s32 %v909_v40, %v900_v19  ;;  %v46_v50 = vshll.u32 %v2727_v26, %v43_v47  ;;  %v49_v48 = vshll.u32 %v2728_v28, %v43_v47  ;;  %v47_v18 = vshrl.u32 %v2728_v28, %v3198_v14 }
  0x91   :  { %v792_v12 = vmul.f32 -0.001358992, %v791_v21  ;;  %v799_v35 = vmul.f32 -0.00019511016, %v791_v21  ;;  %vm913_vm0 = vc.u32 %v3204_v51, %v3192_v16  ;;  %v50_v45 = vshrl.u32 %v2729_v30, %v3198_v14 }
  0x92   :  { %v914_v52 = vadd.s32 1, %v910_v41  ;;  %v52_v17 = vshll.u32 %v2729_v30, %v43_v47  ;;  %v53_v59 = vshrl.u32 %v2730_v32, %v3198_v14  ;;  %v55_v5 = vshll.u32 %v2730_v32, %v43_v47 }
  0x93   :  { %v793_v31 = vadd.f32 0.041655596, %v792_v12  ;;  %v800_v37 = vadd.f32 0.008332121, %v799_v35  ;;  %v56_v39 = vshrl.u32 %v2731_v34, %v3198_v14  ;;  %v807_v13 = vadd.s32 3, %v3202_v22 }
  0x94   :  { %v915_v61 = vsel %vm913_vm0, %v914_v52, %v910_v41  ;;  %v58_v56 = vshll.u32 %v2731_v34, %v43_v47  ;;  %v59_v7 = vshrl.u32 %v2732_v43, %v3198_v14  ;;  %v3227_v10 = vor.u32 %v47_v18, %v46_v50 }
  0x95   :  { %v794_v54 = vmul.f32 %v793_v31, %v791_v21  ;;  %v801_v8 = vmul.f32 %v800_v37, %v791_v21  ;;  %v916_v55 = vadd.s32 %v915_v61, %v911_v24  ;;  %v3229_v0 = vor.u32 %v50_v45, %v49_v48 }
  0x96   :  { %v54_v63 = vor.u32 %v53_v59, %v52_v17  ;;  %v57_v20 = vor.u32 %v56_v39, %v55_v5  ;;  %v60_v15 = vor.u32 %v59_v7, %v58_v56  ;;  %vm61_vm1 = vcmp.lt.s32.totalorder %v3207_v44, 1 }
  0x97   :  { %v795_v25 = vadd.f32 -0.4999988, %v794_v54  ;;  %v802_v29 = vadd.f32 -0.16666654, %v801_v8  ;;  %v917_v33 = vadd.s32 536870912, %v916_v55  ;;  %v808_v38 = vand.u32 3, %v807_v13 }
  0x98   :  { %vm64_vm2 = vcmp.lt.s32.totalorder %v3207_v44, 4  ;;  %v3233_v3 = vshll.u32 %v37_v11, 8  ;;  %vm63_vm3 = vcmp.lt.s32.totalorder %v3207_v44, 3  ;;  %vm62_vm4 = vcmp.lt.s32.totalorder %v3207_v44, 2 }
  0x99   :  { %v796_v19 = vmul.f32 %v795_v25, %v791_v21  ;;  %v803_v46 = vmul.f32 %v802_v29, %v791_v21  ;;  %v3235_v47 = vshrl.u32 %v917_v33, 30  ;;  %v69_v36 = vsel %vm61_vm1, %v3227_v10, %v3229_v0 }
  0x9a   :  { %v70_v42 = vsel %vm64_vm2, %v57_v20, 920167782  ;;  %v74_v40 = vsel %vm64_vm2, %v60_v15, 1326507024  ;;  %v73_v41 = vsel %vm61_vm1, %v3229_v0, %v54_v63  ;;  %vm809_vm6 = vcmp.lt.s32.totalorder %v808_v38, 2 }
  0x9b   :  { %v3247_v11 = vadd.f32 1.0, %v796_v19  ;;  %v804_v21 = vadd.f32 1.0, %v803_v46  ;;  %v919_v24 = vshll.u32 %v3235_v47, 30  ;;  %vm813_vm7 = vcmp.eq.s32.totalorder %v808_v38, 2 }
  0x9c   :  { %v71_v50 = vsel %vm63_vm3, %v54_v63, %v70_v42  ;;  %v75_v48 = vsel %vm63_vm3, %v57_v20, %v74_v40  ;;  %vm810_vm8 = vcmp.eq.s32.totalorder %v808_v38, 0  ;;  %v78_v17 = vand.u32 65535, %v3233_v3 }
  0x9d   :  { %v3257_v12 = vmul.f32 %v804_v21, %v789_v62  ;;  %v3775_v35 = vxor.u32 2147483648, %v3247_v11  ;;  %v920_v18 = vsub.s32 %v916_v55, %v919_v24  ;;  %v72_v52 = vsel %vm62_vm4, %v69_v36, %v71_v50  ;;  %v2670_v36 = vld [vmem:[#allocation2] sm:$0xff] }
  0x9e   :  { %v76_v45 = vsel %vm62_vm4, %v73_v41, %v75_v48  ;;  %v79_v59 = vshrl.u32 %v3233_v3, 16  ;;  %vm806_vm9 = vweird.f32 %v2769_v9  ;;  %v45_v56 = vshrl.u32 %v2727_v26, %v3198_v14 }
  0x9f   :  { %v3776_v31 = vxor.u32 2147483648, %v3257_v12  ;;  %v815_v62 = vsel %vm813_vm7, %v3775_v35, %v3257_v12  ;;  %vm921_vm5 = vcmp.lt.s32.totalorder %v920_v18, 0  ;;  %v922_v37 = vsub.s32 0, %v920_v18 }
  0xa0   :  { %v80_v5 = vand.u32 65535, %v76_v45  ;;  %v81_v39 = vshrl.u32 %v76_v45, 16  ;;  %v103_v7 = vshrl.u32 %v72_v52, 16  ;;  %v102_v29 = vand.u32 65535, %v72_v52 }
  0xa1   :  { %v812_v13 = vsel %vm810_vm8, %v3247_v11, %v3776_v31  ;;  %v923_v61 = vsel %vm921_vm5, %v922_v37, %v920_v18  ;;  %v3280_v42 = vmul.f32 0.5, %v2670_v36  ;;  %v912_v14 = vadd.s32 %v3192_v16, %v3204_v51 }
  0xa2   :  { %v816_v54 = vsel %vm809_vm6, %v812_v13, %v815_v62  ;;  %v924_v8 = vclz %v923_v61  ;;  %v82_v55 = vmul.u32 %v80_v5, %v78_v17  ;;  %v83_v20 = vmul.u32 %v81_v39, %v78_v17 }
  0xa3   :  { %v817_v15 = vsel %vm806_vm9, nan, %v816_v54  ;;  %v84_v25 = vmul.u32 %v80_v5, %v79_v59  ;;  %v85_v19 = vmul.u32 %v81_v39, %v79_v59  ;;  %v65_v38 = vsel %vm61_vm1, %v45_v56, %v3227_v10 }
  0xa4   :  { %975 = vrot.lane.b32.xlu1 %v817_v15, %s2736_s14  ;;  %v2620_v33 = vadd.s32 4294967294, %v924_v8  ;;  %v86_v46 = vshll.u32 %v83_v20, 16  ;;  %v66_v40 = vsel %vm64_vm2, %v54_v63, 2102212464  ;;  %vm820_vm10 = vcmp.lt.s32.totalorder %v3002_v53, 0 }
  0xa5   :  { %v88_v21 = vshll.u32 %v84_v25, 16  ;;  %v105_v41 = vmul.u32 %v103_v7, %v78_v17  ;;  %v104_v52 = vmul.u32 %v102_v29, %v78_v17  ;;  %v106_v45 = vmul.u32 %v102_v29, %v79_v59 }
  0xa6   :  { %vm2621_vm11 = vcmp.lt.s32.totalorder %v2620_v33, 0  ;;  %vm90_vm12 = vc.u32 %v82_v55, %v86_v46  ;;  %v92_v24 = vadd.s32 %v86_v46, %v82_v55  ;;  %v67_v10 = vsel %vm63_vm3, %v3229_v0, %v66_v40 }
  0xa7   :  { %v927_v50 = vsel %vm2621_vm11, 0, %v2620_v33  ;;  %v91_v48 = vsel %vm90_vm12, 1, %v2733_v49  ;;  %v87_v63 = vshrl.u32 %v83_v20, 16  ;;  %v107_v5 = vmul.u32 %v103_v7, %v79_v59 }
  0xa8   :  { %v928_v16 = vsub.s32 32, %v927_v50  ;;  %v929_v51 = vshll.u32 %v920_v18, %v927_v50  ;;  %v932_v62 = vsub.s32 4294967266, %v927_v50  ;;  %v93_v37 = vadd.s32 %v91_v48, %v85_v19 }
  0xa9   :  { %vm94_vm13 = vc.u32 %v92_v24, %v88_v21  ;;  %v108_v56 = vshll.u32 %v105_v41, 16  ;;  %v942_v54 = vsub.s32 4, %v3235_v47  ;;  %v89_v17 = vshrl.u32 %v84_v25, 16 }
  0xaa   :  { %v930_v39 = vshrl.u32 %v912_v14, %v928_v16  ;;  %v933_v13 = vadd.s32 127, %v932_v62  ;;  %v95_v61 = vsel %vm94_vm13, 1, %v2733_v49  ;;  %v110_v55 = vshll.u32 %v106_v45, 16 }
  0xab   :  { %v97_v8 = vadd.s32 %v95_v61, %v93_v37  ;;  %vm112_vm15 = vc.u32 %v104_v52, %v108_v56  ;;  %v114_v29 = vadd.s32 %v108_v56, %v104_v52  ;;  %v109_v19 = vshrl.u32 %v105_v41, 16 }
  0xac   :  { %v931_v18 = vor.u32 %v930_v39, %v929_v51  ;;  %v934_v15 = vshll.u32 %v933_v13, 23  ;;  %v113_v0 = vsel %vm112_vm15, 1, %v2733_v49  ;;  %v1948_v59 = vand.u32 2139095040, %v3280_v42 }
  0xad   :  { %v98_v33 = vadd.s32 %v97_v8, %v87_v63  ;;  %v115_v46 = vadd.s32 %v113_v0, %v107_v5  ;;  %vm116_vm0 = vc.u32 %v114_v29, %v110_v55  ;;  %v943_v25 = vsel %vm820_vm10, %v942_v54, %v3235_v47 }
  0xae   :  { %v935_v7 = vor.u32 4788187, %v934_v15  ;;  %v938_v20 = vcvt.s32.f32 %v931_v18  ;;  %v117_v36 = vsel %vm116_vm0, 1, %v2733_v49  ;;  %v1945_v14 = vand.u32 2147483647, %v3280_v42 }
  0xaf   :  { %v1949_v40 = vshrl.u32 %v1948_v59, 23  ;;  %v111_v24 = vshrl.u32 %v106_v45, 16  ;;  %v119_v41 = vadd.s32 %v117_v36, %v115_v46  ;;  %vm3305_vm1 = vcmp.le.f32.partialorder %v818_v27, 0.7853982  ;;  %v3331_v59 = vld [vmem:[#allocation2 + $0x8] sm:$0xff] }
  0xb0   :  { %v936_v21 = vand.u32 2147483647, %v935_v7  ;;  %v99_v48 = vadd.s32 %v98_v33, %v89_v17  ;;  %v118_v52 = vadd.s32 %v114_v29, %v110_v55  ;;  %v3311_v47 = vsel %vm3305_vm1, 0, %v943_v25 }
  0xb1   :  { %v2640_v16 = vadd.s32 4294967169, %v1949_v40  ;;  %v68_v62 = vsel %vm62_vm4, %v65_v38, %v67_v10  ;;  %v120_v37 = vadd.s32 %v119_v41, %v109_v19  ;;  %v1952_v45 = vand.u32 8388607, %v1945_v14 }
  0xb2   :  { %v939_v51 = vmul.f32 %v938_v20, %v936_v21  ;;  %v962_v39 = vadd.s32 3, %v3311_v47  ;;  %v122_v13 = vmul.u32 %v3233_v3, %v68_v62  ;;  %vm124_vm2 = vc.u32 %v99_v48, %v118_v52 }
  0xb3   :  { %v1955_v63 = vadd.s32 1, %v2640_v16  ;;  %v121_v5 = vadd.s32 %v120_v37, %v111_v24  ;;  %v1953_v38 = vor.u32 8388608, %v1952_v45  ;;  %v3334_v7 = vmul.f32 4.0, %v3331_v59 }
  0xb4   :  { %v940_v27 = vxor.u32 2147483648, %v939_v51  ;;  %v3324_v55 = vand.u32 3, %v962_v39  ;;  %vm961_vm8 = vweird.f32 %v3002_v53  ;;  %vm31_vm5 = vcmp.lt.s32.totalorder %v3090_v58, 0 }
  0xb5   :  { %vm1956_vm3 = vcmp.gt.s32.totalorder %v1955_v63, 0  ;;  %v125_v56 = vadd.s32 1, %v121_v5  ;;  %v3329_v0 = vshll.u32 %v1953_v38, 8  ;;  %vm3380_vm15 = vcmp.le.f32.partialorder %v29_v23, 0.7853982 }
  0xb6   :  { %v941_v61 = vsel %vm820_vm10, %v940_v27, %v939_v51  ;;  %v1957_v54 = vsel %vm1956_vm3, %v1955_v63, 0  ;;  %vm968_vm4 = vcmp.eq.s32.totalorder %v3324_v55, 2  ;;  %vm965_vm6 = vcmp.eq.s32.totalorder %v3324_v55, 0 }
  0xb7   :  { %v944_v44 = vsel %vm3305_vm1, %v3002_v53, %v941_v61  ;;  %v1959_v10 = vand.u32 31, %v1957_v54  ;;  %v126_v8 = vsel %vm124_vm2, %v125_v56, %v121_v5  ;;  %v3352_v45 = vshrl.u32 %v1957_v54, 5 }
  0xb8   :  { %v946_v17 = vmul.f32 %v944_v44, %v944_v44  ;;  %v127_v18 = vadd.s32 %v126_v8, %v122_v13  ;;  %vm964_vm7 = vcmp.lt.s32.totalorder %v3324_v55, 2  ;;  %v123_v13 = vadd.s32 %v118_v52, %v99_v48 }
  0xb9   :  { %v3326_v15 = vsub.s32 32, %v1959_v10  ;;  %v1962_v19 = vshll.u32 %v2727_v26, %v1959_v10  ;;  %v1965_v25 = vshll.u32 %v2728_v28, %v1959_v10  ;;  %v1968_v36 = vshll.u32 %v2729_v30, %v1959_v10 }
  0xba   :  { %v947_v3 = vmul.f32 -0.001358992, %v946_v17  ;;  %v954_v29 = vmul.f32 -0.00019511016, %v946_v17  ;;  %v128_v33 = vadd.s32 536870912, %v127_v18  ;;  %v1971_v24 = vshll.u32 %v2730_v32, %v1959_v10 }
  0xbb   :  { %v1963_v21 = vshrl.u32 %v2728_v28, %v3326_v15  ;;  %v1972_v41 = vshrl.u32 %v2731_v34, %v3326_v15  ;;  %v1966_v51 = vshrl.u32 %v2729_v30, %v3326_v15  ;;  %v1969_v62 = vshrl.u32 %v2730_v32, %v3326_v15 }
  0xbc   :  { %v948_v20 = vadd.f32 0.041655596, %v947_v3  ;;  %v955_v46 = vadd.f32 0.008332121, %v954_v29  ;;  %v3339_v40 = vshrl.u32 %v128_v33, 30  ;;  %v1974_v63 = vshll.u32 %v2731_v34, %v1959_v10 }
  0xbd   :  { %v1975_v27 = vshrl.u32 %v2732_v43, %v3326_v15  ;;  %v184_v61 = vand.u32 2147483647, %v3334_v7  ;;  %v1964_v38 = vor.u32 %v1963_v21, %v1962_v19  ;;  %v1973_v8 = vor.u32 %v1972_v41, %v1971_v24 }
  0xbe   :  { %v949_v50 = vmul.f32 %v948_v20, %v946_v17  ;;  %v956_v16 = vmul.f32 %v955_v46, %v946_v17  ;;  %v130_v37 = vshll.u32 %v3339_v40, 30  ;;  %v187_v54 = vand.u32 2139095040, %v3334_v7 }
  0xbf   :  { %v1967_v29 = vor.u32 %v1966_v51, %v1965_v25  ;;  %v1970_v33 = vor.u32 %v1969_v62, %v1968_v36  ;;  %v1976_v52 = vor.u32 %v1975_v27, %v1974_v63  ;;  %vm1980_vm11 = vcmp.lt.s32.totalorder %v3352_v45, 4 }
  0xc0   :  { %v950_v5 = vadd.f32 -0.4999988, %v949_v50  ;;  %v957_v39 = vadd.f32 -0.16666654, %v956_v16  ;;  %v3360_v56 = vsub.s32 %v127_v18, %v130_v37  ;;  %vm1977_vm12 = vcmp.lt.s32.totalorder %v3352_v45, 1 }
  0xc1   :  { %vm1979_vm13 = vcmp.lt.s32.totalorder %v3352_v45, 3  ;;  %v1986_v19 = vsel %vm1980_vm11, %v1973_v8, 920167782  ;;  %v1994_v46 = vand.u32 65535, %v3329_v0  ;;  %v188_v25 = vshrl.u32 %v187_v54, 23 }
  0xc2   :  { %v951_v3 = vmul.f32 %v950_v5, %v946_v17  ;;  %v958_v10 = vmul.f32 %v957_v39, %v946_v17  ;;  %vm132_vm10 = vcmp.lt.s32.totalorder %v3360_v56, 0  ;;  %v133_v48 = vsub.s32 0, %v3360_v56 }
  0xc3   :  { %v153_v50 = vsub.s32 4, %v3339_v40  ;;  %vm1978_vm0 = vcmp.lt.s32.totalorder %v3352_v45, 2  ;;  %v1985_v16 = vsel %vm1977_vm12, %v1964_v38, %v1967_v29  ;;  %v1990_v51 = vsel %vm1980_vm11, %v1976_v52, 1326507024 }
  0xc4   :  { %v3367_v20 = vadd.f32 1.0, %v951_v3  ;;  %v959_v18 = vadd.f32 1.0, %v958_v10  ;;  %v134_v17 = vsel %vm132_vm10, %v133_v48, %v3360_v56  ;;  %v1989_v63 = vsel %vm1977_vm12, %v1967_v29, %v1970_v33 }
  0xc5   :  { %v135_v41 = vclz %v134_v17  ;;  %v1961_v27 = vshrl.u32 %v2727_v26, %v3326_v15  ;;  %v1991_v5 = vsel %vm1979_vm13, %v1973_v8, %v1990_v51  ;;  %v1995_v39 = vshrl.u32 %v3329_v0, 16 }
  0xc6   :  { %v3375_v36 = vmul.f32 %v959_v18, %v944_v44  ;;  %v3773_v21 = vxor.u32 2147483648, %v3367_v20  ;;  %v1987_v44 = vsel %vm1979_vm13, %v1970_v33, %v1986_v19  ;;  %v2607_v54 = vadd.s32 4294967169, %v188_v25 }
  0xc7   :  { %v2605_v37 = vadd.s32 4294967294, %v135_v41  ;;  %v1982_v10 = vsel %vm1980_vm11, %v1970_v33, 2102212464  ;;  %v1988_v48 = vsel %vm1978_vm0, %v1985_v16, %v1987_v44  ;;  %v154_v52 = vsel %vm31_vm5, %v153_v50, %v3339_v40 }
  0xc8   :  { %v3774_v62 = vxor.u32 2147483648, %v3375_v36  ;;  %v970_v23 = vsel %vm968_vm4, %v3773_v21, %v3375_v36  ;;  %v1992_v18 = vsel %vm1978_vm0, %v1989_v63, %v1991_v5  ;;  %v1981_v55 = vsel %vm1977_vm12, %v1961_v27, %v1964_v38 }
  0xc9   :  { %vm2606_vm1 = vcmp.lt.s32.totalorder %v2605_v37, 0  ;;  %v1983_v41 = vsel %vm1979_vm13, %v1967_v29, %v1982_v10  ;;  %v2019_v16 = vshrl.u32 %v1988_v48, 16  ;;  %v194_v40 = vadd.s32 1, %v2607_v54 }
  0xca   :  { %v967_v3 = vsel %vm965_vm6, %v3367_v20, %v3774_v62  ;;  %v138_v8 = vsel %vm2606_vm1, 0, %v2605_v37  ;;  %v1996_v51 = vand.u32 65535, %v1992_v18  ;;  %v156_v37 = vsel %vm3380_vm15, 0, %v154_v52 }
  0xcb   :  { %v971_v15 = vsel %vm964_vm7, %v967_v3, %v970_v23  ;;  %v139_v19 = vsub.s32 32, %v138_v8  ;;  %v140_v33 = vshll.u32 %v3360_v56, %v138_v8  ;;  %v143_v25 = vsub.s32 4294967266, %v138_v8 }
  0xcc   :  { %v972_v17 = vsel %vm961_vm8, nan, %v971_v15  ;;  %v2018_v23 = vand.u32 65535, %v1988_v48  ;;  %v1997_v63 = vshrl.u32 %v1992_v18, 16  ;;  %v3433_v56 = vand.u32 8388607, %v184_v61 }
  0xcd   :  { %977 = vrot.lane.b32.xlu1 %v972_v17, %s2736_s14  ;;  %v141_v50 = vshrl.u32 %v123_v13, %v139_v19  ;;  %v144_v44 = vadd.s32 127, %v143_v25  ;;  %v3437_v38 = vsel %vm1978_vm0, %v1981_v55, %v1983_v41  ;;  %v2000_v29 = vmul.u32 %v1996_v51, %v1995_v39 }
  0xce   :  { %v1998_v27 = vmul.u32 %v1996_v51, %v1994_v46  ;;  %v1999_v13 = vmul.u32 %v1997_v63, %v1994_v46  ;;  %v2021_v54 = vmul.u32 %v2019_v16, %v1994_v46  ;;  %vm195_vm2 = vcmp.gt.s32.totalorder %v194_v40, 0 }
  0xcf   :  { %v142_v5 = vor.u32 %v141_v50, %v140_v33  ;;  %v145_v3 = vshll.u32 %v144_v44, 23  ;;  %v173_v15 = vadd.s32 3, %v156_v37  ;;  %v2020_v8 = vmul.u32 %v2018_v23, %v1994_v46 }
  0xd0   :  { %v2001_v52 = vmul.u32 %v1997_v63, %v1995_v39  ;;  %v2002_v18 = vshll.u32 %v1999_v13, 16  ;;  %v2004_v17 = vshll.u32 %v2000_v29, 16  ;;  %v2022_v19 = vmul.u32 %v2018_v23, %v1995_v39 }
  0xd1   :  { %v146_v10 = vor.u32 4788187, %v145_v3  ;;  %v149_v48 = vcvt.s32.f32 %v142_v5  ;;  %v2003_v33 = vshrl.u32 %v1999_v13, 16  ;;  %v2023_v50 = vmul.u32 %v2019_v16, %v1995_v39 }
  0xd2   :  { %v2024_v44 = vshll.u32 %v2021_v54, 16  ;;  %vm2006_vm3 = vc.u32 %v1998_v27, %v2002_v18  ;;  %v2008_v45 = vadd.s32 %v2002_v18, %v1998_v27  ;;  %v2026_v55 = vshll.u32 %v2022_v19, 16 }
  0xd3   :  { %v147_v25 = vand.u32 2147483647, %v146_v10  ;;  %v196_v41 = vsel %vm195_vm2, %v194_v40, 0  ;;  %v2007_v21 = vsel %vm2006_vm3, 1, %v2733_v49  ;;  %v2025_v46 = vshrl.u32 %v2021_v54, 16 }
  0xd4   :  { %vm2028_vm4 = vc.u32 %v2020_v8, %v2024_v44  ;;  %v2030_v5 = vadd.s32 %v2024_v44, %v2020_v8  ;;  %v2009_v3 = vadd.s32 %v2007_v21, %v2001_v52  ;;  %vm2010_vm6 = vc.u32 %v2008_v45, %v2004_v17 }
  0xd5   :  { %v150_v51 = vmul.f32 %v149_v48, %v147_v25  ;;  %v2029_v63 = vsel %vm2028_vm4, 1, %v2733_v49  ;;  %v2011_v13 = vsel %vm2010_vm6, 1, %v2733_v49  ;;  %v2005_v16 = vshrl.u32 %v2000_v29, 16 }
  0xd6   :  { %v2031_v39 = vadd.s32 %v2029_v63, %v2023_v50  ;;  %vm2032_vm7 = vc.u32 %v2030_v5, %v2026_v55  ;;  %v2013_v27 = vadd.s32 %v2011_v13, %v2009_v3  ;;  %v198_v40 = vand.u32 31, %v196_v41 }
  0xd7   :  { %v151_v23 = vxor.u32 2147483648, %v150_v51  ;;  %v2033_v10 = vsel %vm2032_vm7, 1, %v2733_v49  ;;  %v2027_v18 = vshrl.u32 %v2022_v19, 16  ;;  %v192_v21 = vor.u32 8388608, %v3433_v56 }
  0xd8   :  { %v2035_v8 = vadd.s32 %v2033_v10, %v2031_v39  ;;  %v2014_v52 = vadd.s32 %v2013_v27, %v2003_v33  ;;  %v3452_v17 = vadd.s32 %v2030_v5, %v2026_v55  ;;  %v3454_v29 = vsub.s32 32, %v198_v40 }
  0xd9   :  { %v152_v48 = vsel %vm31_vm5, %v151_v23, %v150_v51  ;;  %v3458_v50 = vand.u32 3, %v156_v37  ;;  %v2038_v19 = vmul.u32 %v3329_v0, %v3437_v38  ;;  %v3462_v45 = vand.u32 3, %v173_v15 }
  0xda   :  { %v3450_v54 = vsel %vm3380_vm15, %v3090_v58, %v152_v48  ;;  %v2036_v44 = vadd.s32 %v2035_v8, %v2025_v46  ;;  %v3464_v51 = vadd.s32 %v2014_v52, %v2005_v16  ;;  %v3466_v24 = vshrl.u32 %v196_v41, 5 }
  0xdb   :  { %v157_v25 = vmul.f32 %v3450_v54, %v3450_v54  ;;  %v204_v33 = vshll.u32 %v2728_v28, %v198_v40  ;;  %v205_v63 = vshrl.u32 %v2729_v30, %v3454_v29  ;;  %v201_v37 = vshll.u32 %v2727_v26, %v198_v40 }
  0xdc   :  { %v2037_v3 = vadd.s32 %v2036_v44, %v2027_v18  ;;  %vm2040_vm5 = vc.u32 %v3464_v51, %v3452_v17  ;;  %v207_v0 = vshll.u32 %v2729_v30, %v198_v40  ;;  %v208_v38 = vshrl.u32 %v2730_v32, %v3454_v29 }
  0xdd   :  { %v158_v55 = vmul.f32 -0.001358992, %v157_v25  ;;  %v165_v5 = vmul.f32 -0.00019511016, %v157_v25  ;;  %v202_v23 = vshrl.u32 %v2728_v28, %v3454_v29  ;;  %v210_v13 = vshll.u32 %v2730_v32, %v198_v40 }
  0xde   :  { %v2041_v46 = vadd.s32 1, %v2037_v3  ;;  %v211_v39 = vshrl.u32 %v2731_v34, %v3454_v29  ;;  %v213_v16 = vshll.u32 %v2731_v34, %v198_v40  ;;  %v214_v27 = vshrl.u32 %v2732_v43, %v3454_v29 }
  0xdf   :  { %v159_v15 = vadd.f32 0.041655596, %v158_v55  ;;  %v166_v41 = vadd.f32 0.008332121, %v165_v5  ;;  %v3485_v8 = vor.u32 %v205_v63, %v204_v33  ;;  %v3487_v44 = vor.u32 %v208_v38, %v207_v0 }
  0xe0   :  { %v2042_v18 = vsel %vm2040_vm5, %v2041_v46, %v2037_v3  ;;  %v212_v55 = vor.u32 %v211_v39, %v210_v13  ;;  %v215_v5 = vor.u32 %v214_v27, %v213_v16  ;;  %vm487_vm10 = vcmp.lt.s32.totalorder %v3458_v50, 2 }
  0xe1   :  { %v160_v10 = vmul.f32 %v159_v15, %v157_v25  ;;  %v167_v48 = vmul.f32 %v166_v41, %v157_v25  ;;  %v2043_v52 = vadd.s32 %v2042_v18, %v2038_v19  ;;  %v3490_v31 = vor.u32 %v202_v23, %v201_v37 }
  0xe2   :  { %vm216_vm11 = vcmp.lt.s32.totalorder %v3466_v24, 1  ;;  %vm172_vm12 = vweird.f32 %v3090_v58  ;;  %vm488_vm13 = vcmp.eq.s32.totalorder %v3458_v50, 0  ;;  %vm218_vm15 = vcmp.lt.s32.totalorder %v3466_v24, 3 }
  0xe3   :  { %v161_v62 = vadd.f32 -0.4999988, %v160_v10  ;;  %v168_v35 = vadd.f32 -0.16666654, %v167_v48  ;;  %v2044_v40 = vadd.s32 536870912, %v2043_v52  ;;  %vm219_vm0 = vcmp.lt.s32.totalorder %v3466_v24, 4 }
  0xe4   :  { %vm339_vm1 = vcmask 130048   ;;  %vm491_vm2 = vcmp.eq.s32.totalorder %v3458_v50, 2  ;;  %v225_v3 = vsel %vm219_vm0, %v212_v55, 920167782  ;;  %vm217_vm3 = vcmp.lt.s32.totalorder %v3466_v24, 2 }
  0xe5   :  { %v162_v19 = vmul.f32 %v161_v62, %v157_v25  ;;  %v169_v33 = vmul.f32 %v168_v35, %v157_v25  ;;  %v3500_v63 = vshrl.u32 %v2044_v40, 30  ;;  %v228_v37 = vsel %vm216_vm11, %v3485_v8, %v3487_v44 }
  0xe6   :  { %v229_v0 = vsel %vm219_vm0, %v215_v5, 1326507024  ;;  %v224_v25 = vsel %vm216_vm11, %v3490_v31, %v3485_v8  ;;  %v226_v38 = vsel %vm218_vm15, %v3487_v44, %v225_v3  ;;  %vm179_vm4 = vcmp.eq.s32.totalorder %v3462_v45, 2 }
  0xe7   :  { %v163_v62 = vadd.f32 1.0, %v162_v19  ;;  %v170_v35 = vadd.f32 1.0, %v169_v33  ;;  %v2046_v15 = vshll.u32 %v3500_v63, 30  ;;  %v230_v41 = vsel %vm218_vm15, %v212_v55, %v229_v0 }
  0xe8   :  { %v3522_v46 = vshll.u32 %v192_v21, 8  ;;  %vm175_vm6 = vcmp.lt.s32.totalorder %v3462_v45, 2  ;;  %v231_v39 = vsel %vm217_vm3, %v228_v37, %v230_v41  ;;  %vm176_vm7 = vcmp.eq.s32.totalorder %v3462_v45, 0 }
  0xe9   :  { %v171_v23 = vmul.f32 %v170_v35, %v3450_v54  ;;  %v180_v13 = vxor.u32 2147483648, %v163_v62  ;;  %v2047_v16 = vsub.s32 %v2043_v52, %v2046_v15  ;;  %v227_v27 = vsel %vm217_vm3, %v224_v25, %v226_v38 }
  0xea   :  { %v233_v10 = vand.u32 65535, %v3522_v46  ;;  %v234_v54 = vshrl.u32 %v3522_v46, 16  ;;  %v235_v55 = vand.u32 65535, %v231_v39  ;;  %v236_v5 = vshrl.u32 %v231_v39, 16 }
  0xeb   :  { %v177_v48 = vxor.u32 2147483648, %v171_v23  ;;  %v493_v56 = vsel %vm491_vm2, %v180_v13, %v171_v23  ;;  %v181_v21 = vsel %vm179_vm4, %v180_v13, %v171_v23  ;;  %vm2048_vm5 = vcmp.lt.s32.totalorder %v2047_v16, 0 }
  0xec   :  { %v2049_v18 = vsub.s32 0, %v2047_v16  ;;  %v257_v19 = vand.u32 65535, %v227_v27  ;;  %v258_v33 = vshrl.u32 %v227_v27, 16  ;;  %v237_v35 = vmul.u32 %v235_v55, %v233_v10 }
  0xed   :  { %v490_v40 = vsel %vm488_vm13, %v163_v62, %v177_v48  ;;  %v178_v52 = vsel %vm176_vm7, %v163_v62, %v177_v48  ;;  %v238_v41 = vmul.u32 %v236_v5, %v233_v10  ;;  %v239_v50 = vmul.u32 %v235_v55, %v234_v54 }
  0xee   :  { %v494_v3 = vsel %vm487_vm10, %v490_v40, %v493_v56  ;;  %v182_v37 = vsel %vm175_vm6, %v178_v52, %v181_v21  ;;  %v2050_v0 = vsel %vm2048_vm5, %v2049_v18, %v2047_v16  ;;  %v260_v62 = vmul.u32 %v258_v33, %v233_v10 }
  0xef   :  { %v495_v25 = vsel %vm172_vm12, nan, %v494_v3  ;;  %v183_v38 = vsel %vm172_vm12, nan, %v182_v37  ;;  %v2051_v15 = vclz %v2050_v0  ;;  %v240_v45 = vmul.u32 %v236_v5, %v234_v54 }
  0xf0   :  { %652 = vrot.lane.b32.xlu0 %v495_v25, %s2737_s15  ;;  %340 = vst.msk [vmem:[#allocation5] sm:$0xff] %vm339_vm1, %v183_v38  ;;  %v241_v13 = vshll.u32 %v238_v41, 16  ;;  %v2039_v39 = vadd.s32 %v3452_v17, %v3464_v51  ;;  %v243_v27 = vshll.u32 %v239_v50, 16  ;;  %v259_v48 = vmul.u32 %v257_v19, %v233_v10 }
  0xf1   :  { %v2641_v23 = vadd.s32 4294967294, %v2051_v15  ;;  %v261_v18 = vmul.u32 %v257_v19, %v234_v54  ;;  %v263_v40 = vshll.u32 %v260_v62, 16  ;;  %v200_v5 = vshrl.u32 %v2727_v26, %v3454_v29 }
  0xf2   :  { %vm245_vm13 = vc.u32 %v237_v35, %v241_v13  ;;  %v247_v58 = vadd.s32 %v241_v13, %v237_v35  ;;  %v242_v0 = vshrl.u32 %v238_v41, 16  ;;  %v262_v17 = vmul.u32 %v258_v33, %v234_v54 }
  0xf3   :  { %vm2642_vm10 = vcmp.lt.s32.totalorder %v2641_v23, 0  ;;  %v246_v21 = vsel %vm245_vm13, 1, %v2733_v49  ;;  %v221_v10 = vsel %vm219_vm0, %v3487_v44, 2102212464  ;;  %v265_v38 = vshll.u32 %v261_v18, 16 }
  0xf4   :  { %v2054_v56 = vsel %vm2642_vm10, 0, %v2641_v23  ;;  %v248_v37 = vadd.s32 %v246_v21, %v240_v45  ;;  %vm249_vm12 = vc.u32 %v247_v58, %v243_v27  ;;  %vm267_vm2 = vc.u32 %v259_v48, %v263_v40 }
  0xf5   :  { %v2055_v52 = vsub.s32 32, %v2054_v56  ;;  %v2056_v3 = vshll.u32 %v2047_v16, %v2054_v56  ;;  %v2059_v55 = vsub.s32 4294967266, %v2054_v56  ;;  %v250_v35 = vsel %vm249_vm12, 1, %v2733_v49 }
  0xf6   :  { %v252_v19 = vadd.s32 %v250_v35, %v248_v37  ;;  %v3557_v16 = vmul.f32 0.5, %v3331_v59  ;;  %v268_v29 = vsel %vm267_vm2, 1, %v2733_v49  ;;  %v269_v41 = vadd.s32 %v263_v40, %v259_v48 }
  0xf7   :  { %v2057_v51 = vshrl.u32 %v2039_v39, %v2055_v52  ;;  %v2060_v25 = vadd.s32 127, %v2059_v55  ;;  %v2069_v54 = vsub.s32 4, %v3500_v63  ;;  %v244_v33 = vshrl.u32 %v239_v50, 16 }
  0xf8   :  { %v253_v45 = vadd.s32 %v252_v19, %v242_v0  ;;  %v270_v13 = vadd.s32 %v268_v29, %v262_v17  ;;  %v264_v27 = vshrl.u32 %v260_v62, 16  ;;  %vm271_vm0 = vc.u32 %v269_v41, %v265_v38 }
  0xf9   :  { %v2058_v15 = vor.u32 %v2057_v51, %v2056_v3  ;;  %v2061_v23 = vshll.u32 %v2060_v25, 23  ;;  %v220_v58 = vsel %vm216_vm11, %v200_v5, %v3490_v31  ;;  %v222_v59 = vsel %vm218_vm15, %v3485_v8, %v221_v10 }
  0xfa   :  { %v272_v56 = vsel %vm271_vm0, 1, %v2733_v49  ;;  %v2103_v48 = vand.u32 2139095040, %v3557_v16  ;;  %vm1947_vm4 = vcmp.lt.s32.totalorder %v3280_v42, 0  ;;  %v266_v21 = vshrl.u32 %v261_v18, 16 }
  0xfb   :  { %v2062_v39 = vor.u32 4788187, %v2061_v23  ;;  %v2065_v44 = vcvt.s32.f32 %v2058_v15  ;;  %v274_v40 = vadd.s32 %v272_v56, %v270_v13  ;;  %v2070_v62 = vsel %vm1947_vm4, %v2069_v54, %v3500_v63 }
  0xfc   :  { %v3573_v52 = vadd.s32 %v253_v45, %v244_v33  ;;  %v3575_v31 = vadd.s32 %v269_v41, %v265_v38  ;;  %v2104_v3 = vshrl.u32 %v2103_v48, 23  ;;  %v223_v8 = vsel %vm217_vm3, %v220_v58, %v222_v59 }
  0xfd   :  { %v2063_v50 = vand.u32 2147483647, %v2062_v39  ;;  %v275_v37 = vadd.s32 %v274_v40, %v264_v27  ;;  %vm1946_vm11 = vcmp.le.f32.partialorder %v1945_v14, 0.7853982  ;;  %v277_v63 = vmul.u32 %v3522_v46, %v223_v8 }
  0xfe   :  { %v2643_v5 = vadd.s32 4294967169, %v2104_v3  ;;  %v3581_v0 = vsel %vm1946_vm11, 0, %v2070_v62  ;;  %vm279_vm15 = vc.u32 %v3573_v52, %v3575_v31  ;;  %v2100_v41 = vand.u32 2147483647, %v3557_v16 }
  0xff   :  { %v2066_v55 = vmul.f32 %v2065_v44, %v2063_v50  ;;  %v276_v17 = vadd.s32 %v275_v37, %v266_v21  ;;  %v2089_v35 = vadd.s32 3, %v3581_v0  ;;  %vm2088_vm0 = vweird.f32 %v3280_v42 }
 0x100   :  { %v2110_v51 = vadd.s32 1, %v2643_v5  ;;  %v2107_v59 = vand.u32 8388607, %v2100_v41 }
 0x101   :  { %v2067_v18 = vxor.u32 2147483648, %v2066_v55  ;;  %v280_v24 = vadd.s32 1, %v276_v17  ;;  %v2090_v54 = vand.u32 3, %v2089_v35 }
 0x102   :  { %vm2111_vm3 = vcmp.gt.s32.totalorder %v2110_v51, 0 }
 0x103   :  { %v2068_v25 = vsel %vm1947_vm4, %v2067_v18, %v2066_v55  ;;  %v281_v19 = vsel %vm279_vm15, %v280_v24, %v276_v17  ;;  %v2112_v38 = vsel %vm2111_vm3, %v2110_v51, 0  ;;  %vm2092_vm6 = vcmp.eq.s32.totalorder %v2090_v54, 0 }
 0x104   :  { %v2071_v10 = vsel %vm1946_vm11, %v3280_v42, %v2068_v25  ;;  %v282_v15 = vadd.s32 %v281_v19, %v277_v63  ;;  %v2114_v23 = vand.u32 31, %v2112_v38  ;;  %v3598_v48 = vshrl.u32 %v2112_v38, 5 }
 0x105   :  { %v2073_v14 = vmul.f32 %v2071_v10, %v2071_v10  ;;  %vm2091_vm7 = vcmp.lt.s32.totalorder %v2090_v54, 2  ;;  %vm2095_vm13 = vcmp.eq.s32.totalorder %v2090_v54, 2  ;;  %vm186_vm15 = vcmp.lt.s32.totalorder %v3334_v7, 0 }
 0x106   :  { %v283_v33 = vadd.s32 536870912, %v282_v15  ;;  %v3591_v39 = vsub.s32 32, %v2114_v23  ;;  %v2117_v50 = vshll.u32 %v2727_v26, %v2114_v23  ;;  %v2120_v21 = vshll.u32 %v2728_v28, %v2114_v23 }
 0x107   :  { %v2074_v29 = vmul.f32 -0.001358992, %v2073_v14  ;;  %v2081_v46 = vmul.f32 -0.00019511016, %v2073_v14  ;;  %v2126_v3 = vshll.u32 %v2730_v32, %v2114_v23  ;;  %v2129_v5 = vshll.u32 %v2731_v34, %v2114_v23 }
 0x108   :  { %v3593_v44 = vshrl.u32 %v283_v33, 30  ;;  %v2127_v55 = vshrl.u32 %v2731_v34, %v3591_v39  ;;  %v2121_v37 = vshrl.u32 %v2729_v30, %v3591_v39  ;;  %v2130_v18 = vshrl.u32 %v2732_v43, %v3591_v39 }
 0x109   :  { %v2075_v45 = vadd.f32 0.041655596, %v2074_v29  ;;  %v2082_v13 = vadd.f32 0.008332121, %v2081_v46  ;;  %v2123_v51 = vshll.u32 %v2729_v30, %v2114_v23  ;;  %v2124_v25 = vshrl.u32 %v2730_v32, %v3591_v39 }
 0x10a   :  { %v285_v56 = vshll.u32 %v3593_v44, 30  ;;  %v2118_v35 = vshrl.u32 %v2728_v28, %v3591_v39  ;;  %v2131_v19 = vor.u32 %v2130_v18, %v2129_v5  ;;  %v2128_v34 = vor.u32 %v2127_v55, %v2126_v3 }
 0x10b   :  { %v2076_v27 = vmul.f32 %v2075_v45, %v2073_v14  ;;  %v2083_v58 = vmul.f32 %v2082_v13, %v2073_v14  ;;  %vm2135_vm10 = vcmp.lt.s32.totalorder %v3598_v48, 4  ;;  %v3618_v29 = vor.u32 %v2121_v37, %v2120_v21 }
 0x10c   :  { %v286_v8 = vsub.s32 %v282_v15, %v285_v56  ;;  %v3623_v46 = vor.u32 %v2124_v25, %v2123_v51  ;;  %v3625_v28 = vor.u32 %v2118_v35, %v2117_v50  ;;  %vm2132_vm12 = vcmp.lt.s32.totalorder %v3598_v48, 1 }
 0x10d   :  { %v2077_v40 = vadd.f32 -0.4999988, %v2076_v27  ;;  %v2084_v62 = vadd.f32 -0.16666654, %v2083_v58  ;;  %vm2134_vm2 = vcmp.lt.s32.totalorder %v3598_v48, 3  ;;  %v278_v58 = vadd.s32 %v3575_v31, %v3573_v52 }
 0x10e   :  { %vm287_vm5 = vcmp.lt.s32.totalorder %v286_v8, 0  ;;  %v288_v24 = vsub.s32 0, %v286_v8  ;;  %v2145_v33 = vsel %vm2135_vm10, %v2131_v19, 1326507024  ;;  %v2141_v27 = vsel %vm2135_vm10, %v2128_v34, 920167782 }
 0x10f   :  { %v2078_v17 = vmul.f32 %v2077_v40, %v2073_v14  ;;  %v2085_v63 = vmul.f32 %v2084_v62, %v2073_v14  ;;  %v2108_v14 = vor.u32 8388608, %v2107_v59  ;;  %vm2133_vm4 = vcmp.lt.s32.totalorder %v3598_v48, 2 }
 0x110   :  { %v289_v43 = vsel %vm287_vm5, %v288_v24, %v286_v8  ;;  %v2144_v50 = vsel %vm2132_vm12, %v3618_v29, %v3623_v46  ;;  %v2146_v21 = vsel %vm2134_vm2, %v2128_v34, %v2145_v33  ;;  %v2140_v40 = vsel %vm2132_vm12, %v3625_v28, %v3618_v29 }
 0x111   :  { %v3615_v38 = vadd.f32 1.0, %v2078_v17  ;;  %v2086_v15 = vadd.f32 1.0, %v2085_v63  ;;  %v290_v23 = vclz %v289_v43  ;;  %v3641_v59 = vshll.u32 %v2108_v14, 8 }
 0x112   :  { %v2142_v62 = vsel %vm2134_vm2, %v3623_v46, %v2141_v27  ;;  %v2147_v54 = vsel %vm2133_vm4, %v2144_v50, %v2146_v21  ;;  %v1768_v34 = vand.u32 3, %v3056_v6  ;;  %vm3680_vm5 = vcmp.le.f32.partialorder %v184_v61, 0.7853982 }
 0x113   :  { %v3620_v30 = vmul.f32 %v2086_v15, %v2071_v10  ;;  %v2096_v32 = vxor.u32 2147483648, %v3615_v38  ;;  %v2608_v13 = vadd.s32 4294967294, %v290_v23  ;;  %v2150_v18 = vshrl.u32 %v3641_v59, 16 }
 0x114   :  { %v2143_v51 = vsel %vm2133_vm4, %v2140_v40, %v2142_v62  ;;  %v2149_v25 = vand.u32 65535, %v3641_v59  ;;  %v2151_v24 = vand.u32 65535, %v2147_v54  ;;  %v2152_v19 = vshrl.u32 %v2147_v54, 16 }
 0x115   :  { %v2093_v45 = vxor.u32 2147483648, %v3620_v30  ;;  %v2097_v10 = vsel %vm2095_vm13, %v2096_v32, %v3620_v30  ;;  %vm2609_vm11 = vcmp.lt.s32.totalorder %v2608_v13, 0  ;;  %v2173_v15 = vand.u32 65535, %v2143_v51 }
 0x116   :  { %v293_v31 = vsel %vm2609_vm11, 0, %v2608_v13  ;;  %v2153_v43 = vmul.u32 %v2151_v24, %v2149_v25  ;;  %v2155_v14 = vmul.u32 %v2151_v24, %v2150_v18  ;;  %v2174_v23 = vshrl.u32 %v2143_v51, 16 }
 0x117   :  { %v2094_v56 = vsel %vm2092_vm6, %v3615_v38, %v2093_v45  ;;  %v294_v55 = vsub.s32 32, %v293_v31  ;;  %v295_v37 = vshll.u32 %v286_v8, %v293_v31  ;;  %v298_v5 = vsub.s32 4294967266, %v293_v31 }
 0x118   :  { %v2098_v52 = vsel %vm2091_vm7, %v2094_v56, %v2097_v10  ;;  %v2154_v13 = vmul.u32 %v2152_v19, %v2149_v25  ;;  %v2156_v27 = vmul.u32 %v2152_v19, %v2150_v18  ;;  %vm1769_vm3 = vcmp.lt.s32.totalorder %v1768_v34, 2 }
 0x119   :  { %v2099_v3 = vsel %vm2088_vm0, nan, %v2098_v52  ;;  %v296_v17 = vshrl.u32 %v278_v58, %v294_v55  ;;  %v299_v63 = vadd.s32 127, %v298_v5  ;;  %vm1770_vm6 = vcmp.eq.s32.totalorder %v1768_v34, 0 }
 0x11a   :  { %2257 = vrot.lane.b32.xlu1 %v2099_v3, %s2738_s16  ;;  %vm1773_vm7 = vcmp.eq.s32.totalorder %v1768_v34, 2  ;;  %v2159_v58 = vshll.u32 %v2155_v14, 16  ;;  %v1772_v50 = vsel %vm1770_vm6, %v3093_v60, %v1451_v4  ;;  %v2157_v21 = vshll.u32 %v2154_v13, 16 }
 0x11b   :  { %v297_v8 = vor.u32 %v296_v17, %v295_v37  ;;  %v300_v35 = vshll.u32 %v299_v63, 23  ;;  %v1775_v6 = vsel %vm1773_vm7, %v1454_v57, %v3101_v2  ;;  %v308_v31 = vsub.s32 4, %v3593_v44 }
 0x11c   :  { %v1776_v40 = vsel %vm1769_vm3, %v1772_v50, %v1775_v6  ;;  %v2116_v62 = vshrl.u32 %v2727_v26, %v3591_v39  ;;  %vm2161_vm13 = vc.u32 %v2153_v43, %v2157_v21  ;;  %v2163_v60 = vadd.s32 %v2157_v21, %v2153_v43 }
 0x11d   :  { %v301_v33 = vor.u32 4788187, %v300_v35  ;;  %v304_v10 = vcvt.s32.f32 %v297_v8  ;;  %v1777_v4 = vsel %vm1446_vm14, nan, %v1776_v40  ;;  %v2162_v2 = vsel %vm2161_vm13, 1, %v2733_v49 }
 0x11e   :  { %1934 = vrot.lane.b32.xlu2 %v1777_v4, %s2735_s13  ;;  %v2175_v57 = vmul.u32 %v2173_v15, %v2149_v25  ;;  %v2176_v61 = vmul.u32 %v2174_v23, %v2149_v25  ;;  %v2177_v55 = vmul.u32 %v2173_v15, %v2150_v18  ;;  %v2158_v5 = vshrl.u32 %v2154_v13, 16 }
 0x11f   :  { %v302_v56 = vand.u32 2147483647, %v301_v33  ;;  %v2164_v54 = vadd.s32 %v2162_v2, %v2156_v27  ;;  %vm2165_vm11 = vc.u32 %v2163_v60, %v2159_v58  ;;  %v2178_v26 = vmul.u32 %v2174_v23, %v2150_v18 }
 0x120   :  { %v2166_v17 = vsel %vm2165_vm11, 1, %v2733_v49  ;;  %v2179_v39 = vshll.u32 %v2176_v61, 16  ;;  %v2181_v63 = vshll.u32 %v2177_v55, 16  ;;  %v309_v51 = vsel %vm186_vm15, %v308_v31, %v3593_v44 }
 0x121   :  { %v305_v3 = vmul.f32 %v304_v10, %v302_v56  ;;  %v2168_v24 = vadd.s32 %v2166_v17, %v2164_v54  ;;  %v2137_v8 = vsel %vm2135_vm10, %v3623_v46, 2102212464  ;;  %v2160_v19 = vshrl.u32 %v2155_v14, 16 }
 0x122   :  { %vm2183_vm14 = vc.u32 %v2175_v57, %v2179_v39  ;;  %v2185_v18 = vadd.s32 %v2179_v39, %v2175_v57  ;;  %v2136_v44 = vsel %vm2132_vm12, %v2116_v62, %v3625_v28  ;;  %v2180_v43 = vshrl.u32 %v2176_v61, 16 }
 0x123   :  { %v306_v37 = vxor.u32 2147483648, %v305_v3  ;;  %v2169_v15 = vadd.s32 %v2168_v24, %v2158_v5  ;;  %v2184_v34 = vsel %vm2183_vm14, 1, %v2733_v49  ;;  %v2138_v46 = vsel %vm2134_vm2, %v3618_v29, %v2137_v8 }
 0x124   :  { %v2186_v23 = vadd.s32 %v2184_v34, %v2178_v26  ;;  %v311_v14 = vsel %vm3680_vm5, 0, %v309_v51  ;;  %v2182_v27 = vshrl.u32 %v2177_v55, 16  ;;  %v2189_v28 = vadd.s32 %v2185_v18, %v2181_v63 }
 0x125   :  { %v307_v1 = vsel %vm186_vm15, %v306_v37, %v305_v3  ;;  %vm2187_vm15 = vc.u32 %v2185_v18, %v2181_v63  ;;  %v2170_v6 = vadd.s32 %v2169_v15, %v2160_v19  ;;  %v328_v21 = vadd.s32 3, %v311_v14 }
 0x126   :  { %v310_v25 = vsel %vm3680_vm5, %v3334_v7, %v307_v1  ;;  %v2188_v13 = vsel %vm2187_vm15, 1, %v2733_v49  ;;  %v2139_v31 = vsel %vm2133_vm4, %v2136_v44, %v2138_v46  ;;  %v640_v2 = vand.u32 3, %v311_v14 }
 0x127   :  { %v312_v35 = vmul.f32 %v310_v25, %v310_v25  ;;  %v2190_v58 = vadd.s32 %v2188_v13, %v2186_v23  ;;  %v2193_v49 = vmul.u32 %v3641_v59, %v2139_v31  ;;  %vm2195_vm10 = vc.u32 %v2170_v6, %v2189_v28 }
 0x128   :  { %v329_v52 = vand.u32 3, %v328_v21  ;;  %vm645_vm2 = vcmp.eq.s32.totalorder %v640_v2, 2  ;;  %vm641_vm6 = vcmp.lt.s32.totalorder %v640_v2, 2  ;;  %vm642_vm7 = vcmp.eq.s32.totalorder %v640_v2, 0 }
 0x129   :  { %v313_v33 = vmul.f32 -0.001358992, %v312_v35  ;;  %v320_v10 = vmul.f32 -0.00019511016, %v312_v35  ;;  %v2191_v40 = vadd.s32 %v2190_v58, %v2180_v43  ;;  %vm327_vm5 = vweird.f32 %v3334_v7 }
 0x12a   :  { %vm334_vm12 = vcmp.eq.s32.totalorder %v329_v52, 2  ;;  %vm330_vm4 = vcmp.lt.s32.totalorder %v329_v52, 2  ;;  %vm331_vm3 = vcmp.eq.s32.totalorder %v329_v52, 0  ;;  %v2410_v46 = vand.u32 3, %v3581_v0 }
 0x12b   :  { %v314_v56 = vadd.f32 0.041655596, %v313_v33  ;;  %v321_v50 = vadd.f32 0.008332121, %v320_v10  ;;  %v2192_v4 = vadd.s32 %v2191_v40, %v2182_v27  ;;  %v2194_v10 = vadd.s32 %v2189_v28, %v2170_v6 }
 0x12c   :  { %vm2412_vm14 = vcmp.eq.s32.totalorder %v2410_v46, 0  ;;  %vm2411_vm15 = vcmp.lt.s32.totalorder %v2410_v46, 2  ;;  %v1128_v0 = vand.u32 3, %v3202_v22  ;;  %v1282_v40 = vand.u32 3, %v3311_v47 }
 0x12d   :  { %v315_v62 = vmul.f32 %v314_v56, %v312_v35  ;;  %v322_v3 = vmul.f32 %v321_v50, %v312_v35  ;;  %v2196_v57 = vadd.s32 1, %v2192_v4  ;;  %v2414_v50 = vsel %vm2412_vm14, %v3615_v38, %v2093_v45 }
 0x12e   :  { %v3789_v38 = vxor.u32 2147483648, %v3257_v12  ;;  %v3790_v22 = vxor.u32 2147483648, %v3247_v11  ;;  %v3792_v52 = vxor.u32 2147483648, %v3367_v20 }
 0x12f   :  { %v316_v29 = vadd.f32 -0.4999988, %v315_v62  ;;  %v323_v60 = vadd.f32 -0.16666654, %v322_v3  ;;  %v2197_v37 = vsel %vm2195_vm10, %v2196_v57, %v2192_v4  ;;  %vm1129_vm10 = vcmp.lt.s32.totalorder %v1128_v0, 2 }
 0x130   :  { %v2198_v17 = vadd.s32 %v2197_v37, %v2193_v49 }
 0x131   :  { %v317_v61 = vmul.f32 %v316_v29, %v312_v35  ;;  %v324_v55 = vmul.f32 %v323_v60, %v312_v35  ;;  %v3791_v60 = vxor.u32 2147483648, %v3375_v36 }
 0x132   :  { %v2199_v39 = vadd.s32 536870912, %v2198_v17 }
 0x133   :  { %v318_v5 = vadd.f32 1.0, %v317_v61  ;;  %v325_v54 = vadd.f32 1.0, %v324_v55 }
 0x134   :  { %v3716_v51 = vshrl.u32 %v2199_v39, 30 }
 0x135   :  { %v326_v48 = vmul.f32 %v325_v54, %v310_v25  ;;  %v335_v26 = vxor.u32 2147483648, %v318_v5 }
 0x136   :  { %v2201_v18 = vshll.u32 %v3716_v51, 30 }
 0x137   :  { %v332_v59 = vxor.u32 2147483648, %v326_v48  ;;  %v336_v63 = vsel %vm334_vm12, %v335_v26, %v326_v48  ;;  %v647_v1 = vsel %vm645_vm2, %v335_v26, %v326_v48  ;;  %vm1130_vm12 = vcmp.eq.s32.totalorder %v1128_v0, 0 }
 0x138   :  { %v2202_v34 = vsub.s32 %v2198_v17, %v2201_v18  ;;  %vm1133_vm2 = vcmp.eq.s32.totalorder %v1128_v0, 2 }
 0x139   :  { %v333_v24 = vsel %vm331_vm3, %v318_v5, %v332_v59  ;;  %v644_v8 = vsel %vm642_vm7, %v318_v5, %v332_v59  ;;  %v1135_v47 = vsel %vm1133_vm2, %v3790_v22, %v3257_v12  ;;  %vm1283_vm3 = vcmp.lt.s32.totalorder %v1282_v40, 2 }
 0x13a   :  { %v337_v35 = vsel %vm330_vm4, %v333_v24, %v336_v63  ;;  %v648_v19 = vsel %vm641_vm6, %v644_v8, %v647_v1  ;;  %vm2203_vm13 = vcmp.lt.s32.totalorder %v2202_v34, 0  ;;  %v2204_v44 = vsub.s32 0, %v2202_v34 }
 0x13b   :  { %v338_v25 = vsel %vm327_vm5, nan, %v337_v35  ;;  %v649_v15 = vsel %vm327_vm5, nan, %v648_v19  ;;  %vm1284_vm4 = vcmp.eq.s32.totalorder %v1282_v40, 0  ;;  %vm1287_vm6 = vcmp.eq.s32.totalorder %v1282_v40, 2 }
 0x13c   :  { %341 = vst.msk [vmem:[#allocation5 + $0x8] sm:$0xff] %vm339_vm1, %v338_v25  ;;  %654 = vrot.lane.b32.xlu0 %v649_v15, %s2737_s15  ;;  %v2205_v43 = vsel %vm2203_vm13, %v2204_v44, %v2202_v34  ;;  %vm2415_vm1 = vcmp.eq.s32.totalorder %v2410_v46, 2  ;;  %v1286_v49 = vsel %vm1284_vm4, %v3367_v20, %v3791_v60  ;;  %v1289_v2 = vsel %vm1287_vm6, %v3792_v52, %v3375_v36  ;;  %v1616_v46 = vpop.permute.xlu0 %1615 }
 0x13d   :  { %v2206_v23 = vclz %v2205_v43  ;;  %v2417_v6 = vsel %vm2415_vm1, %v2096_v32, %v3620_v30  ;;  %v1132_v30 = vsel %vm1130_vm12, %v3247_v11, %v3789_v38  ;;  %vm2101_vm7 = vcmp.le.f32.partialorder %v2100_v41, 0.7853982 }
 0x13e   :  { %v2418_v28 = vsel %vm2411_vm15, %v2414_v50, %v2417_v6  ;;  %v1136_v32 = vsel %vm1129_vm10, %v1132_v30, %v1135_v47  ;;  %v2224_v12 = vsub.s32 4, %v3716_v51  ;;  %v1290_v9 = vsel %vm1283_vm3, %v1286_v49, %v1289_v2 }
 0x13f   :  { %v2644_v33 = vadd.s32 4294967294, %v2206_v23  ;;  %v2419_v4 = vsel %vm2088_vm0, nan, %v2418_v28  ;;  %v1137_v29 = vsel %vm806_vm9, nan, %v1136_v32  ;;  %vm2102_vm0 = vcmp.lt.s32.totalorder %v3557_v16, 0 }
 0x140   :  { %1294 = vrot.lane.b32.xlu2 %v1137_v29, %s2740_s18  ;;  %v1291_v37 = vsel %vm961_vm8, nan, %v1290_v9  ;;  %v2225_v20 = vsel %vm2102_vm0, %v2224_v12, %v3716_v51  ;;  %vm2243_vm15 = vweird.f32 %v3557_v16  ;;  %vm658_vm1 = vcmask 654848  }
 0x141   :  { %vm2645_vm11 = vcmp.lt.s32.totalorder %v2644_v33, 0  ;;  %v2227_v54 = vsel %vm2101_vm7, 0, %v2225_v20  ;;  %vm981_vm10 = vcmask 261248   ;;  %vm1300_vm12 = vcmask 786048  }
 0x142   :  { %v2209_v7 = vsel %vm2645_vm11, 0, %v2644_v33  ;;  %v2244_v41 = vadd.s32 3, %v2227_v54  ;;  %v2564_v1 = vand.u32 3, %v2227_v54  ;;  %vm1621_vm2 = vcmask 392448  }
 0x143   :  { %v2210_v13 = vsub.s32 32, %v2209_v7  ;;  %v2211_v14 = vshll.u32 %v2202_v34, %v2209_v7  ;;  %v2214_v27 = vsub.s32 4294967266, %v2209_v7  ;;  %vm1940_vm4 = vcmask 917248  }
 0x144   :  { %2576 = vrot.lane.b32.xlu0 %v2419_v4, %s2739_s17  ;;  %v2245_v24 = vand.u32 3, %v2244_v41  ;;  %vm2569_vm9 = vcmp.eq.s32.totalorder %v2564_v1, 2  ;;  %vm2565_vm5 = vcmp.lt.s32.totalorder %v2564_v1, 2  ;;  %vm2566_vm13 = vcmp.eq.s32.totalorder %v2564_v1, 0 }
 0x145   :  { %v2212_v58 = vshrl.u32 %v2194_v10, %v2210_v13  ;;  %v2215_v56 = vadd.s32 127, %v2214_v27  ;;  %v1937_v13 = vpop.permute.xlu0 %1936  ;;  %vm2263_vm3 = vcmask 523648   ;;  %vm2582_vm6 = vcmask 1048448  }
 0x146   :  { %vm2250_vm8 = vcmp.eq.s32.totalorder %v2245_v24, 2  ;;  %vm2247_vm11 = vcmp.eq.s32.totalorder %v2245_v24, 0  ;;  %vm2246_vm14 = vcmp.lt.s32.totalorder %v2245_v24, 2 }
 0x147   :  { %v2213_v21 = vor.u32 %v2212_v58, %v2211_v14  ;;  %v2216_v31 = vshll.u32 %v2215_v56, 23  ;;  %v1618_v14 = vpop.permute.xlu1 %1617 }
 0x148   :  { %1296 = vrot.lane.b32.xlu2 %v1291_v37, %s2740_s18 }
 0x149   :  { %v2217_v62 = vor.u32 4788187, %v2216_v31  ;;  %v2220_v3 = vcvt.s32.f32 %v2213_v21 }
 0x14b   :  { %v2218_v45 = vand.u32 2147483647, %v2217_v62 }
 0x14d   :  { %v2221_v42 = vmul.f32 %v2220_v3, %v2218_v45 }
 0x14f   :  { %v2222_v11 = vxor.u32 2147483648, %v2221_v42  ;;  %v976_v58 = vpop.permute.xlu1 %975 }
 0x151   :  { %v2223_v57 = vsel %vm2102_vm0, %v2222_v11, %v2221_v42 }
 0x152   :  { %v2226_v61 = vsel %vm2101_vm7, %v3557_v16, %v2223_v57 }
 0x153   :  { %v2228_v55 = vmul.f32 %v2226_v61, %v2226_v61 }
 0x155   :  { %v2229_v36 = vmul.f32 -0.001358992, %v2228_v55  ;;  %v2236_v5 = vmul.f32 -0.00019511016, %v2228_v55 }
 0x157   :  { %v2230_v17 = vadd.f32 0.041655596, %v2229_v36  ;;  %v2237_v48 = vadd.f32 0.008332121, %v2236_v5  ;;  %v978_v56 = vpop.permute.xlu1 %977 }
 0x159   :  { %v2231_v26 = vmul.f32 %v2230_v17, %v2228_v55  ;;  %v2238_v39 = vmul.f32 %v2237_v48, %v2228_v55 }
 0x15b   :  { %v2232_v59 = vadd.f32 -0.4999988, %v2231_v26  ;;  %v2239_v63 = vadd.f32 -0.16666654, %v2238_v39 }
 0x15d   :  { %v2233_v8 = vmul.f32 %v2232_v59, %v2228_v55  ;;  %v2240_v18 = vmul.f32 %v2239_v63, %v2228_v55 }
 0x15f   :  { %v2234_v35 = vadd.f32 1.0, %v2233_v8  ;;  %v2241_v53 = vadd.f32 1.0, %v2240_v18 }
 0x161   :  { %v2242_v51 = vmul.f32 %v2241_v53, %v2226_v61  ;;  %v2251_v19 = vxor.u32 2147483648, %v2234_v35 }
 0x162   :  { %v653_v27 = vpop.permute.xlu0 %652 }
 0x163   :  { %v2248_v25 = vxor.u32 2147483648, %v2242_v51  ;;  %v2571_v15 = vsel %vm2569_vm9, %v2251_v19, %v2242_v51  ;;  %v2252_v34 = vsel %vm2250_vm8, %v2251_v19, %v2242_v51  ;;  %659 = vst.msk [vmem:[#allocation5] sm:$0xff] %vm658_vm1, %v653_v27 }
 0x164   :  { %982 = vst.msk [vmem:[#allocation5] sm:$0xff] %vm981_vm10, %v976_v58 }
 0x165   :  { %v2568_v44 = vsel %vm2566_vm13, %v2234_v35, %v2248_v25  ;;  %v2249_v43 = vsel %vm2247_vm11, %v2234_v35, %v2248_v25 }
 0x166   :  { %v2572_v23 = vsel %vm2565_vm5, %v2568_v44, %v2571_v15  ;;  %v2253_v33 = vsel %vm2246_vm14, %v2249_v43, %v2252_v34 }
 0x167   :  { %v2573_v10 = vsel %vm2243_vm15, nan, %v2572_v23  ;;  %v2254_v7 = vsel %vm2243_vm15, nan, %v2253_v33 }
 0x168   :  { %2578 = vrot.lane.b32.xlu1 %v2573_v10, %s2739_s17  ;;  %2259 = vrot.lane.b32.xlu2 %v2254_v7, %s2738_s16 }
 0x178   :  { %v1935_v16 = vpop.permute.xlu2 %1934 }
 0x18c   :  { %v2258_v21 = vpop.permute.xlu1 %2257 }
 0x19a   :  { %v1295_v50 = vpop.permute.xlu2 %1294 }
 0x19b   :  { %1301 = vst.msk [vmem:[#allocation5] sm:$0xff] %vm1300_vm12, %v1295_v50 }
 0x19c   :  { %1622 = vst.msk [vmem:[#allocation5] sm:$0xff] %vm1621_vm2, %v1616_v46 }
 0x19d   :  { %1941 = vst.msk [vmem:[#allocation5] sm:$0xff] %vm1940_vm4, %v1935_v16 }
 0x19e   :  { %2264 = vst.msk [vmem:[#allocation5] sm:$0xff] %vm2263_vm3, %v2258_v21 }
 0x1a2   :  { %v1297_v6 = vpop.permute.xlu2 %1296 }
 0x1ae   :  { %v655_v31 = vpop.permute.xlu0 %654 }
 0x1af   :  { %660 = vst.msk [vmem:[#allocation5 + $0x8] sm:$0xff] %vm658_vm1, %v655_v31 }
 0x1b0   :  { %983 = vst.msk [vmem:[#allocation5 + $0x8] sm:$0xff] %vm981_vm10, %v978_v56 }
 0x1b1   :  { %1302 = vst.msk [vmem:[#allocation5 + $0x8] sm:$0xff] %vm1300_vm12, %v1297_v6 }
 0x1b2   :  { %1623 = vst.msk [vmem:[#allocation5 + $0x8] sm:$0xff] %vm1621_vm2, %v1618_v14 }
 0x1b3   :  { %1942 = vst.msk [vmem:[#allocation5 + $0x8] sm:$0xff] %vm1940_vm4, %v1937_v13 }
 0x1b6   :  { %v2577_v28 = vpop.permute.xlu0 %2576 }
 0x1b7   :  { %2583 = vst.msk [vmem:[#allocation5] sm:$0xff] %vm2582_vm6, %v2577_v28 }
 0x1c2   :  { %v2260_v0 = vpop.permute.xlu2 %2259 }
 0x1c3   :  { %2265 = vst.msk [vmem:[#allocation5 + $0x8] sm:$0xff] %vm2263_vm3, %v2260_v0 }
 0x1da   :  { %v2579_v40 = vpop.permute.xlu1 %2578 }
 0x1db   :  { %2584 = vst.msk [vmem:[#allocation5 + $0x8] sm:$0xff] %vm2582_vm6, %v2579_v40 }
 0x1dc   :  { %2597 = dma.vmem_to_hbm [thread:$0]  %s2590_s20, 256, %s2592_s23, [#allocation4], %s2725_s11, %s2725_s11, %s2726_s12  }
 0x1dd   :  { %2722 = dma.done.wait [#allocation4], 256  }
 0x1de   :  { %2723 = vsyncadd [#allocation4], 4294967040 }
 0x1df   :  { %2602 = vsyncpa [#allocation3], 1 }
 0x1e0   :  { %2603 = vsyncpa [#allocation4], 1 }

</bundles_post_ra>
